<compile_context>
chip_gen: v6e
topology: v6e:2x2x1
jax: 0.10.0
libtpu: 0.0.40
codegen_flags: <defaults>
</compile_context>

<pallas_src>
import functools

import jax
import jax.numpy as jnp
from jax import lax
from jax.experimental import pallas as pl
from jax.experimental.pallas import tpu as pltpu

HIDDEN = 128            # self.hidden_dim in the PyTorch module
GRU_H = HIDDEN // 2     # per-direction hidden size (bidirectional)
G3 = 3 * GRU_H          # gates (r, z, n) per direction
G6 = 2 * G3             # both directions


# ----------------------------------------------------------------------------
# Row-wise fused kernels (M-tiled, weights resident)
# ----------------------------------------------------------------------------
def _fcin_proj_kernel(x_ref, w_in_ref, b_in_ref, w_ih_ref, b_ih_ref, o_ref):
    # gx = relu(x @ W_in + b_in) @ W_ih_comb + b_ih_comb
    h = jnp.dot(x_ref[...], w_in_ref[...], preferred_element_type=jnp.float32)
    h = jnp.maximum(h + b_in_ref[...], 0.0)
    y = jnp.dot(h, w_ih_ref[...], preferred_element_type=jnp.float32) + b_ih_ref[...]
    o_ref[...] = y.astype(o_ref.dtype)


def _ln_matmul_kernel(x_ref, g_ref, b_ref, w_ref, bw_ref, o_ref, *, out_relu):
    # y = relu(LN(x)) @ W + b   (optionally ReLU on the output: fc_output path)
    x = x_ref[...]
    mu = jnp.mean(x, axis=-1, keepdims=True)
    var = jnp.mean(jnp.square(x - mu), axis=-1, keepdims=True)
    h = (x - mu) * lax.rsqrt(var + 1e-5) * g_ref[...] + b_ref[...]
    h = jnp.maximum(h, 0.0)
    y = jnp.dot(h, w_ref[...], preferred_element_type=jnp.float32) + bw_ref[...]
    if out_relu:
        y = jnp.maximum(y, 0.0)
    o_ref[...] = y.astype(o_ref.dtype)


def _row_tiled_call(kernel, x, weights, n_out, *, block_rows=512):
    """Launch a row-wise fused kernel tiled over M (weights stay whole)."""
    m, k = x.shape
    bm = m if m <= block_rows else block_rows          # >=512-row tiles ~85% HBM roofline
    grid = (pl.cdiv(m, bm),)
    in_specs = [pl.BlockSpec((bm, k), lambda i: (i, 0))]
    in_specs += [pl.BlockSpec(w.shape, lambda i, nd=w.ndim: (0,) * nd) for w in weights]
    return pl.pallas_call(
        kernel,
        out_shape=jax.ShapeDtypeStruct((m, n_out), jnp.float32),
        grid=grid,
        in_specs=in_specs,
        out_specs=pl.BlockSpec((bm, n_out), lambda i: (i, 0)),
        compiler_params=pltpu.CompilerParams(
            dimension_semantics=("parallel",),          # v7x: shard M over both TCs
            vmem_limit_bytes=32 * 1024 * 1024,
        ),
    )(x, *weights)


# ----------------------------------------------------------------------------
# Fused bidirectional GRU layer: whole time scan inside one kernel invocation
# ----------------------------------------------------------------------------
def _bigru_kernel(gx_ref, whh_ref, bhh_ref, o_ref, h_ref):
    """Bidirectional GRU scan.

    gx_ref : (T, B, 6H)  precomputed x @ W_ih + b_ih;
                         lanes [0:3H) = forward gates (r,z,n), [3H:6H) = backward.
    whh_ref: (2H, 6H)    block-diagonal W_hh (fwd rows 0:H x cols 0:3H,
                         bwd rows H:2H x cols 3H:6H) -> one MXU push per step.
    bhh_ref: (1, 6H)
    o_ref  : (T, B, 2H)  lane-dense output (fwd in lanes 0:H, bwd in H:2H).
    h_ref  : (B, 2H)     VMEM scratch hidden state (fwd | bwd).
    """
    t_len = gx_ref.shape[0]
    h = GRU_H

    h_ref[...] = jnp.zeros_like(h_ref)
    whh = whh_ref[...]
    bhh = bhh_ref[...]

    def step(t, carry):
        hc = h_ref[...]                                                   # (B, 2H)
        gh = jnp.dot(hc, whh, preferred_element_type=jnp.float32) + bhh   # (B, 6H)
        gx_f = gx_ref[t]                 # forward reads time t
        gx_b = gx_ref[t_len - 1 - t]     # backward reads reversed time (no HBM flip)

        # forward direction (PyTorch gate order r, z, n)
        rf = jax.nn.sigmoid(gx_f[:, 0:h] + gh[:, 0:h])
        zf = jax.nn.sigmoid(gx_f[:, h:2 * h] + gh[:, h:2 * h])
        nf = jnp.tanh(gx_f[:, 2 * h:3 * h] + rf * gh[:, 2 * h:3 * h])
        hf = (1.0 - zf) * nf + zf * hc[:, 0:h]

        # backward direction
        rb = jax.nn.sigmoid(gx_b[:, 3 * h:4 * h] + gh[:, 3 * h:4 * h])
        zb = jax.nn.sigmoid(gx_b[:, 4 * h:5 * h] + gh[:, 4 * h:5 * h])
        nb = jnp.tanh(gx_b[:, 5 * h:6 * h] + rb * gh[:, 5 * h:6 * h])
        hb = (1.0 - zb) * nb + zb * hc[:, h:2 * h]

        h_ref[:, 0:h] = hf
        h_ref[:, h:2 * h] = hb
        o_ref[t, :, 0:h] = hf
        o_ref[t_len - 1 - t, :, h:2 * h] = hb
        return carry

    lax.fori_loop(0, t_len, step, 0)


def bigru_pallas(gx_tbg, w_hh_bd, b_hh):
    """gx_tbg: (T, B, 6H) -> (T, B, 2H). Single kernel invocation, in-body scan."""
    t, b, _ = gx_tbg.shape
    # TODO(synk): chunk T (grid over time blocks with carried h scratch) if
    # T*B*6H*4 bytes approaches the scoped VMEM budget (esp. v7x: 64 MiB phys).
    return pl.pallas_call(
        _bigru_kernel,
        out_shape=jax.ShapeDtypeStruct((t, b, 2 * GRU_H), jnp.float32),
        scratch_shapes=[pltpu.VMEM((b, 2 * GRU_H), jnp.float32)],
        compiler_params=pltpu.CompilerParams(vmem_limit_bytes=32 * 1024 * 1024),
    )(gx_tbg, w_hh_bd, b_hh)


# ----------------------------------------------------------------------------
# Model glue
# ----------------------------------------------------------------------------
def tec_gru_forward(tec, params):
    """tec: (B, T, in_dim) -> (B, T, out_dim). Matches PyTorch TEC_GRU.forward (eval)."""
    bsz, t, d = tec.shape
    m = t * bsz
    # Go time-major once; everything downstream is (T*B, feat) flat slabs.
    x = jnp.transpose(tec, (1, 0, 2)).reshape(m, d)

    p1, p2 = params["gru1"], params["gru2"]

    # K1: fc_input + ReLU (+ dropout=identity) + gru1 input projection (both dirs).
    gx1 = _row_tiled_call(_fcin_proj_kernel, x,
                          [params["fc_in_w"], params["fc_in_b"], p1["w_ih"], p1["b_ih"]],
                          G6)
    # K2: bidirectional GRU layer 1.
    h1 = bigru_pallas(gx1.reshape(t, bsz, G6), p1["w_hh_bd"], p1["b_hh"])

    # K3: LayerNorm + ReLU (+ dropout=identity) + gru2 input projection.
    # NOTE: both LayerNorms share params — the PyTorch module reuses one self.layer_norm.
    gx2 = _row_tiled_call(functools.partial(_ln_matmul_kernel, out_relu=False),
                          h1.reshape(m, HIDDEN),
                          [params["ln_g"], params["ln_b"], p2["w_ih"], p2["b_ih"]],
                          G6)
    # K4: bidirectional GRU layer 2.
    h2 = bigru_pallas(gx2.reshape(t, bsz, G6), p2["w_hh_bd"], p2["b_hh"])

    # K5: LayerNorm + ReLU + fc_output + ReLU, output lane-padded to a 128 multiple.
    out_dim = params["fc_out_w"].shape[1]
    n_pad = ((out_dim + 127) // 128) * 128
    w_out = jnp.pad(params["fc_out_w"], ((0, 0), (0, n_pad - out_dim)))
    b_out = jnp.pad(params["fc_out_b"], ((0, 0), (0, n_pad - out_dim)))
    y = _row_tiled_call(functools.partial(_ln_matmul_kernel, out_relu=True),
                        h2.reshape(m, HIDDEN),
                        [params["ln_g"], params["ln_b"], w_out, b_out],
                        n_pad)
    y = y[:, :out_dim]

    return jnp.transpose(y.reshape(t, bsz, out_dim), (1, 0, 2))


def init_params(key, in_dim, out_dim):
    """Deterministic synthetic parameters (PyTorch-like init, stored fused/transposed)."""
    def uniform(k, shape, fan_in):
        bound = 1.0 / jnp.sqrt(jnp.float32(fan_in))
        return jax.random.uniform(k, shape, jnp.float32, -bound, bound)

    keys = iter(jax.random.split(key, 32))

    def gru_params(input_size):
        w_ih_f = uniform(next(keys), (input_size, G3), GRU_H)   # W_ih^T fwd
        w_ih_b = uniform(next(keys), (input_size, G3), GRU_H)   # W_ih^T bwd
        w_hh_f = uniform(next(keys), (GRU_H, G3), GRU_H)        # W_hh^T fwd
        w_hh_b = uniform(next(keys), (GRU_H, G3), GRU_H)        # W_hh^T bwd
        b_ih_f = uniform(next(keys), (1, G3), GRU_H)
        b_ih_b = uniform(next(keys), (1, G3), GRU_H)
        b_hh_f = uniform(next(keys), (1, G3), GRU_H)
        b_hh_b = uniform(next(keys), (1, G3), GRU_H)
        # Fused layouts: [fwd gates | bwd gates] along lanes; W_hh block-diagonal
        # so one (B,128)x(128,384) matmul serves both directions per step.
        w_ih = jnp.concatenate([w_ih_f, w_ih_b], axis=1)            # (in, 6H)
        b_ih = jnp.concatenate([b_ih_f, b_ih_b], axis=1)            # (1, 6H)
        w_hh_bd = jnp.zeros((2 * GRU_H, G6), jnp.float32)
        w_hh_bd = w_hh_bd.at[:GRU_H, :G3].set(w_hh_f)
        w_hh_bd = w_hh_bd.at[GRU_H:, G3:].set(w_hh_b)
        b_hh = jnp.concatenate([b_hh_f, b_hh_b], axis=1)            # (1, 6H)
        return {"w_ih": w_ih, "b_ih": b_ih, "w_hh_bd": w_hh_bd, "b_hh": b_hh}

    params = {
        "fc_in_w": uniform(next(keys), (in_dim, HIDDEN), in_dim),     # Linear weight^T
        "fc_in_b": uniform(next(keys), (1, HIDDEN), in_dim),
        "fc_out_w": uniform(next(keys), (HIDDEN, out_dim), HIDDEN),
        "fc_out_b": uniform(next(keys), (1, out_dim), HIDDEN),
        "ln_g": jnp.ones((1, HIDDEN), jnp.float32),
        "ln_b": jnp.zeros((1, HIDDEN), jnp.float32),
        "gru1": gru_params(HIDDEN),
        "gru2": gru_params(HIDDEN),
    }
    return params


if __name__ == "__main__":
    B, T, IN_DIM, OUT_DIM = 2, 8, 16, 8
    key = jax.random.PRNGKey(0)
    k_param, k_data = jax.random.split(key)

    params = init_params(k_param, IN_DIM, OUT_DIM)
    tec = jax.random.normal(k_data, (B, T, IN_DIM), jnp.float32)

    out = jax.jit(tec_gru_forward)(tec, params)
    jax.block_until_ready(out)

    assert out.shape == (B, T, OUT_DIM)
    assert bool(jnp.all(jnp.isfinite(out)))
    print("KERNEL_OK")
</pallas_src>

<mosaic_0001>
module attributes {stable_mosaic.version = 11 : i64} {
  func.func @_fcin_proj_kernel(%arg0: i32, %arg1: memref<16x16xf32, #tpu.memory_space<vmem>>, %arg2: memref<16x128xf32, #tpu.memory_space<vmem>>, %arg3: memref<1x128xf32, #tpu.memory_space<vmem>>, %arg4: memref<128x384xf32, #tpu.memory_space<vmem>>, %arg5: memref<1x384xf32, #tpu.memory_space<vmem>>, %arg6: memref<16x384xf32, #tpu.memory_space<vmem>>) attributes {dimension_semantics = [#tpu.dimension_semantics<parallel>], iteration_bounds = array<i64: 1>, scalar_prefetch = 0 : i64, scratch_operands = 0 : i64, tpu.core_type = #tpu.core_type<tc>, window_params = [{transform_indices = @transform_0, window_bounds = array<i64: 16, 16>}, {pipeline_mode = #tpu.pipeline_mode<synchronous>, transform_indices = @transform_1, window_bounds = array<i64: 16, 128>}, {pipeline_mode = #tpu.pipeline_mode<synchronous>, transform_indices = @transform_2, window_bounds = array<i64: 1, 128>}, {pipeline_mode = #tpu.pipeline_mode<synchronous>, transform_indices = @transform_3, window_bounds = array<i64: 128, 384>}, {pipeline_mode = #tpu.pipeline_mode<synchronous>, transform_indices = @transform_4, window_bounds = array<i64: 1, 384>}, {transform_indices = @transform_5, window_bounds = array<i64: 16, 384>}]} {
    %c0 = arith.constant 0 : index
    %c0_0 = arith.constant 0 : index
    %0 = vector.load %arg1[%c0, %c0_0] : memref<16x16xf32, #tpu.memory_space<vmem>>, vector<16x16xf32>
    %c0_1 = arith.constant 0 : index
    %c0_2 = arith.constant 0 : index
    %1 = vector.load %arg2[%c0_1, %c0_2] : memref<16x128xf32, #tpu.memory_space<vmem>>, vector<16x128xf32>
    %cst = arith.constant dense<0.000000e+00> : vector<16x128xf32>
    %2 = tpu.matmul %0, %1, %cst {dimension_numbers = #tpu.dot_dimension_numbers<[1], [0], [0], [1], [0, 0, 1, 1], [], []>} : vector<16x16xf32>, vector<16x128xf32>, vector<16x128xf32> -> vector<16x128xf32>
    %c0_3 = arith.constant 0 : index
    %c0_4 = arith.constant 0 : index
    %3 = vector.load %arg3[%c0_3, %c0_4] : memref<1x128xf32, #tpu.memory_space<vmem>>, vector<1x128xf32>
    %4 = vector.broadcast %3 : vector<1x128xf32> to vector<16x128xf32>
    %5 = arith.addf %2, %4 : vector<16x128xf32>
    %cst_5 = arith.constant 0.000000e+00 : f32
    %6 = vector.broadcast %cst_5 : f32 to vector<16x128xf32>
    %7 = arith.maximumf %5, %6 : vector<16x128xf32>
    %c0_6 = arith.constant 0 : index
    %c0_7 = arith.constant 0 : index
    %8 = vector.load %arg4[%c0_6, %c0_7] : memref<128x384xf32, #tpu.memory_space<vmem>>, vector<128x384xf32>
    %cst_8 = arith.constant dense<0.000000e+00> : vector<16x384xf32>
    %9 = tpu.matmul %7, %8, %cst_8 {dimension_numbers = #tpu.dot_dimension_numbers<[1], [0], [0], [1], [0, 0, 1, 1], [], []>} : vector<16x128xf32>, vector<128x384xf32>, vector<16x384xf32> -> vector<16x384xf32>
    %c0_9 = arith.constant 0 : index
    %c0_10 = arith.constant 0 : index
    %10 = vector.load %arg5[%c0_9, %c0_10] : memref<1x384xf32, #tpu.memory_space<vmem>>, vector<1x384xf32>
    %11 = vector.broadcast %10 : vector<1x384xf32> to vector<16x384xf32>
    %12 = arith.addf %9, %11 : vector<16x384xf32>
    %c0_11 = arith.constant 0 : index
    %c0_12 = arith.constant 0 : index
    %13 = vector.load %arg6[%c0_11, %c0_12] : memref<16x384xf32, #tpu.memory_space<vmem>>, vector<16x384xf32>
    tpu.vector_store %arg6[%c0_11, %c0_12], %12 {strides = array<i32>} : memref<16x384xf32, #tpu.memory_space<vmem>>, vector<16x384xf32>,
    return
  }
  func.func @transform_0(%arg0: i32) -> (i32, i32) {
    %c0_i32 = arith.constant 0 : i32
    %c0_i32_0 = arith.constant 0 : i32
    return %arg0, %c0_i32 : i32, i32
  }
  func.func @transform_1(%arg0: i32) -> (i32, i32) {
    %c0_i32 = arith.constant 0 : i32
    %c0_i32_0 = arith.constant 0 : i32
    %c0_i32_1 = arith.constant 0 : i32
    return %c0_i32, %c0_i32_0 : i32, i32
  }
  func.func @transform_2(%arg0: i32) -> (i32, i32) {
    %c0_i32 = arith.constant 0 : i32
    %c0_i32_0 = arith.constant 0 : i32
    %c0_i32_1 = arith.constant 0 : i32
    return %c0_i32, %c0_i32_0 : i32, i32
  }
  func.func @transform_3(%arg0: i32) -> (i32, i32) {
    %c0_i32 = arith.constant 0 : i32
    %c0_i32_0 = arith.constant 0 : i32
    %c0_i32_1 = arith.constant 0 : i32
    return %c0_i32, %c0_i32_0 : i32, i32
  }
  func.func @transform_4(%arg0: i32) -> (i32, i32) {
    %c0_i32 = arith.constant 0 : i32
    %c0_i32_0 = arith.constant 0 : i32
    %c0_i32_1 = arith.constant 0 : i32
    return %c0_i32, %c0_i32_0 : i32, i32
  }
  func.func @transform_5(%arg0: i32) -> (i32, i32) {
    %c0_i32 = arith.constant 0 : i32
    %c0_i32_0 = arith.constant 0 : i32
    return %arg0, %c0_i32 : i32, i32
  }
}

module attributes {stable_mosaic.version = 11 : i64} {
  func.func @_bigru_kernel(%arg0: memref<8x2x384xf32, #tpu.memory_space<vmem>>, %arg1: memref<128x384xf32, #tpu.memory_space<vmem>>, %arg2: memref<1x384xf32, #tpu.memory_space<vmem>>, %arg3: memref<8x2x128xf32, #tpu.memory_space<vmem>>, %arg4: memref<2x128xf32, #tpu.memory_space<vmem>>) attributes {dimension_semantics = [], scalar_prefetch = 0 : i64, scratch_operands = 1 : i64, tpu.core_type = #tpu.core_type<tc>} {
    %cst = arith.constant 0.000000e+00 : f32
    %0 = vector.broadcast %cst : f32 to vector<2x128xf32>
    %c0 = arith.constant 0 : index
    %c0_0 = arith.constant 0 : index
    %1 = vector.load %arg4[%c0, %c0_0] : memref<2x128xf32, #tpu.memory_space<vmem>>, vector<2x128xf32>
    tpu.vector_store %arg4[%c0, %c0_0], %0 {strides = array<i32>} : memref<2x128xf32, #tpu.memory_space<vmem>>, vector<2x128xf32>,
    %c0_1 = arith.constant 0 : index
    %c0_2 = arith.constant 0 : index
    %2 = vector.load %arg1[%c0_1, %c0_2] : memref<128x384xf32, #tpu.memory_space<vmem>>, vector<128x384xf32>
    %c0_3 = arith.constant 0 : index
    %c0_4 = arith.constant 0 : index
    %3 = vector.load %arg2[%c0_3, %c0_4] : memref<1x384xf32, #tpu.memory_space<vmem>>, vector<1x384xf32>
    %c0_i32 = arith.constant 0 : i32
    %c8_i32 = arith.constant 8 : i32
    %4 = arith.addi %c0_i32, %c8_i32 : i32
    %c1_i32 = arith.constant 1 : i32
    scf.for %arg5 = %c0_i32 to %4 step %c1_i32  : i32 {
      %c0_6 = arith.constant 0 : index
      %c0_7 = arith.constant 0 : index
      %5 = vector.load %arg4[%c0_6, %c0_7] : memref<2x128xf32, #tpu.memory_space<vmem>>, vector<2x128xf32>
      %cst_8 = arith.constant dense<0.000000e+00> : vector<2x384xf32>
      %6 = tpu.matmul %5, %2, %cst_8 {dimension_numbers = #tpu.dot_dimension_numbers<[1], [0], [0], [1], [0, 0, 1, 1], [], []>} : vector<2x128xf32>, vector<128x384xf32>, vector<2x384xf32> -> vector<2x384xf32>
      %7 = vector.broadcast %3 : vector<1x384xf32> to vector<2x384xf32>
      %8 = arith.addf %6, %7 : vector<2x384xf32>
      %9 = arith.index_cast %arg5 : i32 to index
      %c0_9 = arith.constant 0 : index
      %c0_10 = arith.constant 0 : index
      %10 = vector.load %arg0[%9, %c0_9, %c0_10] : memref<8x2x384xf32, #tpu.memory_space<vmem>>, vector<1x2x384xf32>
      %11 = vector.shape_cast %10 : vector<1x2x384xf32> to vector<2x384xf32>
      %c7_i32 = arith.constant 7 : i32
      %12 = arith.subi %c7_i32, %arg5 : i32
      %13 = arith.index_cast %12 : i32 to index
      %c0_11 = arith.constant 0 : index
      %c0_12 = arith.constant 0 : index
      %14 = vector.load %arg0[%13, %c0_11, %c0_12] : memref<8x2x384xf32, #tpu.memory_space<vmem>>, vector<1x2x384xf32>
      %15 = vector.shape_cast %14 : vector<1x2x384xf32> to vector<2x384xf32>
      %16 = vector.extract_strided_slice %11 {offsets = [0, 0], sizes = [2, 64], strides = [1, 1]} : vector<2x384xf32> to vector<2x64xf32>
      %17 = vector.extract_strided_slice %8 {offsets = [0, 0], sizes = [2, 64], strides = [1, 1]} : vector<2x384xf32> to vector<2x64xf32>
      %18 = arith.addf %16, %17 : vector<2x64xf32>
      %19 = arith.negf %18 : vector<2x64xf32>
      %20 = math.exp %19 : vector<2x64xf32>
      %cst_13 = arith.constant 1.000000e+00 : f32
      %21 = vector.broadcast %cst_13 : f32 to vector<2x64xf32>
      %22 = arith.addf %21, %20 : vector<2x64xf32>
      %23 = arith.divf %21, %22 : vector<2x64xf32>
      %24 = vector.extract_strided_slice %11 {offsets = [0, 64], sizes = [2, 64], strides = [1, 1]} : vector<2x384xf32> to vector<2x64xf32>
      %25 = vector.extract_strided_slice %8 {offsets = [0, 64], sizes = [2, 64], strides = [1, 1]} : vector<2x384xf32> to vector<2x64xf32>
      %26 = arith.addf %24, %25 : vector<2x64xf32>
      %27 = arith.negf %26 : vector<2x64xf32>
      %28 = math.exp %27 : vector<2x64xf32>
      %cst_14 = arith.constant 1.000000e+00 : f32
      %29 = vector.broadcast %cst_14 : f32 to vector<2x64xf32>
      %30 = arith.addf %29, %28 : vector<2x64xf32>
      %31 = arith.divf %29, %30 : vector<2x64xf32>
      %32 = vector.extract_strided_slice %11 {offsets = [0, 128], sizes = [2, 64], strides = [1, 1]} : vector<2x384xf32> to vector<2x64xf32>
      %33 = vector.extract_strided_slice %8 {offsets = [0, 128], sizes = [2, 64], strides = [1, 1]} : vector<2x384xf32> to vector<2x64xf32>
      %34 = arith.mulf %23, %33 : vector<2x64xf32>
      %35 = arith.addf %32, %34 : vector<2x64xf32>
      %36 = math.tanh %35 : vector<2x64xf32>
      %cst_15 = arith.constant 1.000000e+00 : f32
      %37 = vector.broadcast %cst_15 : f32 to vector<2x64xf32>
      %38 = arith.subf %37, %31 : vector<2x64xf32>
      %39 = arith.mulf %38, %36 : vector<2x64xf32>
      %40 = vector.extract_strided_slice %5 {offsets = [0, 0], sizes = [2, 64], strides = [1, 1]} : vector<2x128xf32> to vector<2x64xf32>
      %41 = arith.mulf %31, %40 : vector<2x64xf32>
      %42 = arith.addf %39, %41 : vector<2x64xf32>
      %43 = vector.extract_strided_slice %15 {offsets = [0, 192], sizes = [2, 64], strides = [1, 1]} : vector<2x384xf32> to vector<2x64xf32>
      %44 = vector.extract_strided_slice %8 {offsets = [0, 192], sizes = [2, 64], strides = [1, 1]} : vector<2x384xf32> to vector<2x64xf32>
      %45 = arith.addf %43, %44 : vector<2x64xf32>
      %46 = arith.negf %45 : vector<2x64xf32>
      %47 = math.exp %46 : vector<2x64xf32>
      %cst_16 = arith.constant 1.000000e+00 : f32
      %48 = vector.broadcast %cst_16 : f32 to vector<2x64xf32>
      %49 = arith.addf %48, %47 : vector<2x64xf32>
      %50 = arith.divf %48, %49 : vector<2x64xf32>
      %51 = vector.extract_strided_slice %15 {offsets = [0, 256], sizes = [2, 64], strides = [1, 1]} : vector<2x384xf32> to vector<2x64xf32>
      %52 = vector.extract_strided_slice %8 {offsets = [0, 256], sizes = [2, 64], strides = [1, 1]} : vector<2x384xf32> to vector<2x64xf32>
      %53 = arith.addf %51, %52 : vector<2x64xf32>
      %54 = arith.negf %53 : vector<2x64xf32>
      %55 = math.exp %54 : vector<2x64xf32>
      %cst_17 = arith.constant 1.000000e+00 : f32
      %56 = vector.broadcast %cst_17 : f32 to vector<2x64xf32>
      %57 = arith.addf %56, %55 : vector<2x64xf32>
      %58 = arith.divf %56, %57 : vector<2x64xf32>
      %59 = vector.extract_strided_slice %15 {offsets = [0, 320], sizes = [2, 64], strides = [1, 1]} : vector<2x384xf32> to vector<2x64xf32>
      %60 = vector.extract_strided_slice %8 {offsets = [0, 320], sizes = [2, 64], strides = [1, 1]} : vector<2x384xf32> to vector<2x64xf32>
      %61 = arith.mulf %50, %60 : vector<2x64xf32>
      %62 = arith.addf %59, %61 : vector<2x64xf32>
      %63 = math.tanh %62 : vector<2x64xf32>
      %cst_18 = arith.constant 1.000000e+00 : f32
      %64 = vector.broadcast %cst_18 : f32 to vector<2x64xf32>
      %65 = arith.subf %64, %58 : vector<2x64xf32>
      %66 = arith.mulf %65, %63 : vector<2x64xf32>
      %67 = vector.extract_strided_slice %5 {offsets = [0, 64], sizes = [2, 64], strides = [1, 1]} : vector<2x128xf32> to vector<2x64xf32>
      %68 = arith.mulf %58, %67 : vector<2x64xf32>
      %69 = arith.addf %66, %68 : vector<2x64xf32>
      %c0_19 = arith.constant 0 : index
      %c0_20 = arith.constant 0 : index
      %70 = vector.load %arg4[%c0_19, %c0_20] : memref<2x128xf32, #tpu.memory_space<vmem>>, vector<2x64xf32>
      tpu.vector_store %arg4[%c0_19, %c0_20], %42 {strides = array<i32>} : memref<2x128xf32, #tpu.memory_space<vmem>>, vector<2x64xf32>,
      %c0_21 = arith.constant 0 : index
      %c64 = arith.constant 64 : index
      %71 = vector.load %arg4[%c0_21, %c64] : memref<2x128xf32, #tpu.memory_space<vmem>>, vector<2x64xf32>
      tpu.vector_store %arg4[%c0_21, %c64], %69 {strides = array<i32>} : memref<2x128xf32, #tpu.memory_space<vmem>>, vector<2x64xf32>,
      %72 = arith.index_cast %arg5 : i32 to index
      %c0_22 = arith.constant 0 : index
      %c0_23 = arith.constant 0 : index
      %73 = vector.load %arg3[%72, %c0_22, %c0_23] : memref<8x2x128xf32, #tpu.memory_space<vmem>>, vector<1x2x64xf32>
      %74 = vector.shape_cast %73 : vector<1x2x64xf32> to vector<2x64xf32>
      %75 = vector.shape_cast %42 : vector<2x64xf32> to vector<1x2x64xf32>
      tpu.vector_store %arg3[%72, %c0_22, %c0_23], %75 {strides = array<i32>} : memref<8x2x128xf32, #tpu.memory_space<vmem>>, vector<1x2x64xf32>,
      %c7_i32_24 = arith.constant 7 : i32
      %76 = arith.subi %c7_i32_24, %arg5 : i32
      %77 = arith.index_cast %76 : i32 to index
      %c0_25 = arith.constant 0 : index
      %c64_26 = arith.constant 64 : index
      %78 = vector.load %arg3[%77, %c0_25, %c64_26] : memref<8x2x128xf32, #tpu.memory_space<vmem>>, vector<1x2x64xf32>
      %79 = vector.shape_cast %78 : vector<1x2x64xf32> to vector<2x64xf32>
      %80 = vector.shape_cast %69 : vector<2x64xf32> to vector<1x2x64xf32>
      tpu.vector_store %arg3[%77, %c0_25, %c64_26], %80 {strides = array<i32>} : memref<8x2x128xf32, #tpu.memory_space<vmem>>, vector<1x2x64xf32>,
    }
    %c8_i32_5 = arith.constant 8 : i32
    return
  }
}

module attributes {stable_mosaic.version = 11 : i64} {
  func.func @_ln_matmul_kernel(%arg0: i32, %arg1: memref<16x128xf32, #tpu.memory_space<vmem>>, %arg2: memref<1x128xf32, #tpu.memory_space<vmem>>, %arg3: memref<1x128xf32, #tpu.memory_space<vmem>>, %arg4: memref<128x384xf32, #tpu.memory_space<vmem>>, %arg5: memref<1x384xf32, #tpu.memory_space<vmem>>, %arg6: memref<16x384xf32, #tpu.memory_space<vmem>>) attributes {dimension_semantics = [#tpu.dimension_semantics<parallel>], iteration_bounds = array<i64: 1>, scalar_prefetch = 0 : i64, scratch_operands = 0 : i64, tpu.core_type = #tpu.core_type<tc>, window_params = [{transform_indices = @transform_0, window_bounds = array<i64: 16, 128>}, {pipeline_mode = #tpu.pipeline_mode<synchronous>, transform_indices = @transform_1, window_bounds = array<i64: 1, 128>}, {pipeline_mode = #tpu.pipeline_mode<synchronous>, transform_indices = @transform_2, window_bounds = array<i64: 1, 128>}, {pipeline_mode = #tpu.pipeline_mode<synchronous>, transform_indices = @transform_3, window_bounds = array<i64: 128, 384>}, {pipeline_mode = #tpu.pipeline_mode<synchronous>, transform_indices = @transform_4, window_bounds = array<i64: 1, 384>}, {transform_indices = @transform_5, window_bounds = array<i64: 16, 384>}]} {
    %c0 = arith.constant 0 : index
    %c0_0 = arith.constant 0 : index
    %0 = vector.load %arg1[%c0, %c0_0] : memref<16x128xf32, #tpu.memory_space<vmem>>, vector<16x128xf32>
    %cst = arith.constant dense<0.000000e+00> : vector<16xf32>
    %1 = vector.multi_reduction <add>, %0, %cst [1] : vector<16x128xf32> to vector<16xf32>
    %2 = vector.shape_cast %1 : vector<16xf32> to vector<16x1xf32>
    %cst_1 = arith.constant 1.280000e+02 : f32
    %3 = vector.broadcast %cst_1 : f32 to vector<16x1xf32>
    %4 = arith.divf %2, %3 : vector<16x1xf32>
    %5 = vector.broadcast %4 : vector<16x1xf32> to vector<16x128xf32>
    %6 = arith.subf %0, %5 : vector<16x128xf32>
    %7 = arith.mulf %6, %6 : vector<16x128xf32>
    %cst_2 = arith.constant dense<0.000000e+00> : vector<16xf32>
    %8 = vector.multi_reduction <add>, %7, %cst_2 [1] : vector<16x128xf32> to vector<16xf32>
    %9 = vector.shape_cast %8 : vector<16xf32> to vector<16x1xf32>
    %cst_3 = arith.constant 1.280000e+02 : f32
    %10 = vector.broadcast %cst_3 : f32 to vector<16x1xf32>
    %11 = arith.divf %9, %10 : vector<16x1xf32>
    %12 = vector.broadcast %4 : vector<16x1xf32> to vector<16x128xf32>
    %13 = arith.subf %0, %12 : vector<16x128xf32>
    %cst_4 = arith.constant 9.99999974E-6 : f32
    %14 = vector.broadcast %cst_4 : f32 to vector<16x1xf32>
    %15 = arith.addf %11, %14 : vector<16x1xf32>
    %16 = math.rsqrt %15 : vector<16x1xf32>
    %17 = vector.broadcast %16 : vector<16x1xf32> to vector<16x128xf32>
    %18 = arith.mulf %13, %17 : vector<16x128xf32>
    %c0_5 = arith.constant 0 : index
    %c0_6 = arith.constant 0 : index
    %19 = vector.load %arg2[%c0_5, %c0_6] : memref<1x128xf32, #tpu.memory_space<vmem>>, vector<1x128xf32>
    %20 = vector.broadcast %19 : vector<1x128xf32> to vector<16x128xf32>
    %21 = arith.mulf %18, %20 : vector<16x128xf32>
    %c0_7 = arith.constant 0 : index
    %c0_8 = arith.constant 0 : index
    %22 = vector.load %arg3[%c0_7, %c0_8] : memref<1x128xf32, #tpu.memory_space<vmem>>, vector<1x128xf32>
    %23 = vector.broadcast %22 : vector<1x128xf32> to vector<16x128xf32>
    %24 = arith.addf %21, %23 : vector<16x128xf32>
    %cst_9 = arith.constant 0.000000e+00 : f32
    %25 = vector.broadcast %cst_9 : f32 to vector<16x128xf32>
    %26 = arith.maximumf %24, %25 : vector<16x128xf32>
    %c0_10 = arith.constant 0 : index
    %c0_11 = arith.constant 0 : index
    %27 = vector.load %arg4[%c0_10, %c0_11] : memref<128x384xf32, #tpu.memory_space<vmem>>, vector<128x384xf32>
    %cst_12 = arith.constant dense<0.000000e+00> : vector<16x384xf32>
    %28 = tpu.matmul %26, %27, %cst_12 {dimension_numbers = #tpu.dot_dimension_numbers<[1], [0], [0], [1], [0, 0, 1, 1], [], []>} : vector<16x128xf32>, vector<128x384xf32>, vector<16x384xf32> -> vector<16x384xf32>
    %c0_13 = arith.constant 0 : index
    %c0_14 = arith.constant 0 : index
    %29 = vector.load %arg5[%c0_13, %c0_14] : memref<1x384xf32, #tpu.memory_space<vmem>>, vector<1x384xf32>
    %30 = vector.broadcast %29 : vector<1x384xf32> to vector<16x384xf32>
    %31 = arith.addf %28, %30 : vector<16x384xf32>
    %c0_15 = arith.constant 0 : index
    %c0_16 = arith.constant 0 : index
    %32 = vector.load %arg6[%c0_15, %c0_16] : memref<16x384xf32, #tpu.memory_space<vmem>>, vector<16x384xf32>
    tpu.vector_store %arg6[%c0_15, %c0_16], %31 {strides = array<i32>} : memref<16x384xf32, #tpu.memory_space<vmem>>, vector<16x384xf32>,
    return
  }
  func.func @transform_0(%arg0: i32) -> (i32, i32) {
    %c0_i32 = arith.constant 0 : i32
    %c0_i32_0 = arith.constant 0 : i32
    return %arg0, %c0_i32 : i32, i32
  }
  func.func @transform_1(%arg0: i32) -> (i32, i32) {
    %c0_i32 = arith.constant 0 : i32
    %c0_i32_0 = arith.constant 0 : i32
    %c0_i32_1 = arith.constant 0 : i32
    return %c0_i32, %c0_i32_0 : i32, i32
  }
  func.func @transform_2(%arg0: i32) -> (i32, i32) {
    %c0_i32 = arith.constant 0 : i32
    %c0_i32_0 = arith.constant 0 : i32
    %c0_i32_1 = arith.constant 0 : i32
    return %c0_i32, %c0_i32_0 : i32, i32
  }
  func.func @transform_3(%arg0: i32) -> (i32, i32) {
    %c0_i32 = arith.constant 0 : i32
    %c0_i32_0 = arith.constant 0 : i32
    %c0_i32_1 = arith.constant 0 : i32
    return %c0_i32, %c0_i32_0 : i32, i32
  }
  func.func @transform_4(%arg0: i32) -> (i32, i32) {
    %c0_i32 = arith.constant 0 : i32
    %c0_i32_0 = arith.constant 0 : i32
    %c0_i32_1 = arith.constant 0 : i32
    return %c0_i32, %c0_i32_0 : i32, i32
  }
  func.func @transform_5(%arg0: i32) -> (i32, i32) {
    %c0_i32 = arith.constant 0 : i32
    %c0_i32_0 = arith.constant 0 : i32
    return %arg0, %c0_i32 : i32, i32
  }
}

module attributes {stable_mosaic.version = 11 : i64} {
  func.func @_ln_matmul_kernel(%arg0: i32, %arg1: memref<16x128xf32, #tpu.memory_space<vmem>>, %arg2: memref<1x128xf32, #tpu.memory_space<vmem>>, %arg3: memref<1x128xf32, #tpu.memory_space<vmem>>, %arg4: memref<128x128xf32, #tpu.memory_space<vmem>>, %arg5: memref<1x128xf32, #tpu.memory_space<vmem>>, %arg6: memref<16x128xf32, #tpu.memory_space<vmem>>) attributes {dimension_semantics = [#tpu.dimension_semantics<parallel>], iteration_bounds = array<i64: 1>, scalar_prefetch = 0 : i64, scratch_operands = 0 : i64, tpu.core_type = #tpu.core_type<tc>, window_params = [{transform_indices = @transform_0, window_bounds = array<i64: 16, 128>}, {pipeline_mode = #tpu.pipeline_mode<synchronous>, transform_indices = @transform_1, window_bounds = array<i64: 1, 128>}, {pipeline_mode = #tpu.pipeline_mode<synchronous>, transform_indices = @transform_2, window_bounds = array<i64: 1, 128>}, {pipeline_mode = #tpu.pipeline_mode<synchronous>, transform_indices = @transform_3, window_bounds = array<i64: 128, 128>}, {pipeline_mode = #tpu.pipeline_mode<synchronous>, transform_indices = @transform_4, window_bounds = array<i64: 1, 128>}, {transform_indices = @transform_5, window_bounds = array<i64: 16, 128>}]} {
    %c0 = arith.constant 0 : index
    %c0_0 = arith.constant 0 : index
    %0 = vector.load %arg1[%c0, %c0_0] : memref<16x128xf32, #tpu.memory_space<vmem>>, vector<16x128xf32>
    %cst = arith.constant dense<0.000000e+00> : vector<16xf32>
    %1 = vector.multi_reduction <add>, %0, %cst [1] : vector<16x128xf32> to vector<16xf32>
    %2 = vector.shape_cast %1 : vector<16xf32> to vector<16x1xf32>
    %cst_1 = arith.constant 1.280000e+02 : f32
    %3 = vector.broadcast %cst_1 : f32 to vector<16x1xf32>
    %4 = arith.divf %2, %3 : vector<16x1xf32>
    %5 = vector.broadcast %4 : vector<16x1xf32> to vector<16x128xf32>
    %6 = arith.subf %0, %5 : vector<16x128xf32>
    %7 = arith.mulf %6, %6 : vector<16x128xf32>
    %cst_2 = arith.constant dense<0.000000e+00> : vector<16xf32>
    %8 = vector.multi_reduction <add>, %7, %cst_2 [1] : vector<16x128xf32> to vector<16xf32>
    %9 = vector.shape_cast %8 : vector<16xf32> to vector<16x1xf32>
    %cst_3 = arith.constant 1.280000e+02 : f32
    %10 = vector.broadcast %cst_3 : f32 to vector<16x1xf32>
    %11 = arith.divf %9, %10 : vector<16x1xf32>
    %12 = vector.broadcast %4 : vector<16x1xf32> to vector<16x128xf32>
    %13 = arith.subf %0, %12 : vector<16x128xf32>
    %cst_4 = arith.constant 9.99999974E-6 : f32
    %14 = vector.broadcast %cst_4 : f32 to vector<16x1xf32>
    %15 = arith.addf %11, %14 : vector<16x1xf32>
    %16 = math.rsqrt %15 : vector<16x1xf32>
    %17 = vector.broadcast %16 : vector<16x1xf32> to vector<16x128xf32>
    %18 = arith.mulf %13, %17 : vector<16x128xf32>
    %c0_5 = arith.constant 0 : index
    %c0_6 = arith.constant 0 : index
    %19 = vector.load %arg2[%c0_5, %c0_6] : memref<1x128xf32, #tpu.memory_space<vmem>>, vector<1x128xf32>
    %20 = vector.broadcast %19 : vector<1x128xf32> to vector<16x128xf32>
    %21 = arith.mulf %18, %20 : vector<16x128xf32>
    %c0_7 = arith.constant 0 : index
    %c0_8 = arith.constant 0 : index
    %22 = vector.load %arg3[%c0_7, %c0_8] : memref<1x128xf32, #tpu.memory_space<vmem>>, vector<1x128xf32>
    %23 = vector.broadcast %22 : vector<1x128xf32> to vector<16x128xf32>
    %24 = arith.addf %21, %23 : vector<16x128xf32>
    %cst_9 = arith.constant 0.000000e+00 : f32
    %25 = vector.broadcast %cst_9 : f32 to vector<16x128xf32>
    %26 = arith.maximumf %24, %25 : vector<16x128xf32>
    %c0_10 = arith.constant 0 : index
    %c0_11 = arith.constant 0 : index
    %27 = vector.load %arg4[%c0_10, %c0_11] : memref<128x128xf32, #tpu.memory_space<vmem>>, vector<128x128xf32>
    %cst_12 = arith.constant dense<0.000000e+00> : vector<16x128xf32>
    %28 = tpu.matmul %26, %27, %cst_12 {dimension_numbers = #tpu.dot_dimension_numbers<[1], [0], [0], [1], [0, 0, 1, 1], [], []>} : vector<16x128xf32>, vector<128x128xf32>, vector<16x128xf32> -> vector<16x128xf32>
    %c0_13 = arith.constant 0 : index
    %c0_14 = arith.constant 0 : index
    %29 = vector.load %arg5[%c0_13, %c0_14] : memref<1x128xf32, #tpu.memory_space<vmem>>, vector<1x128xf32>
    %30 = vector.broadcast %29 : vector<1x128xf32> to vector<16x128xf32>
    %31 = arith.addf %28, %30 : vector<16x128xf32>
    %cst_15 = arith.constant 0.000000e+00 : f32
    %32 = vector.broadcast %cst_15 : f32 to vector<16x128xf32>
    %33 = arith.maximumf %31, %32 : vector<16x128xf32>
    %c0_16 = arith.constant 0 : index
    %c0_17 = arith.constant 0 : index
    %34 = vector.load %arg6[%c0_16, %c0_17] : memref<16x128xf32, #tpu.memory_space<vmem>>, vector<16x128xf32>
    tpu.vector_store %arg6[%c0_16, %c0_17], %33 {strides = array<i32>} : memref<16x128xf32, #tpu.memory_space<vmem>>, vector<16x128xf32>,
    return
  }
  func.func @transform_0(%arg0: i32) -> (i32, i32) {
    %c0_i32 = arith.constant 0 : i32
    %c0_i32_0 = arith.constant 0 : i32
    return %arg0, %c0_i32 : i32, i32
  }
  func.func @transform_1(%arg0: i32) -> (i32, i32) {
    %c0_i32 = arith.constant 0 : i32
    %c0_i32_0 = arith.constant 0 : i32
    %c0_i32_1 = arith.constant 0 : i32
    return %c0_i32, %c0_i32_0 : i32, i32
  }
  func.func @transform_2(%arg0: i32) -> (i32, i32) {
    %c0_i32 = arith.constant 0 : i32
    %c0_i32_0 = arith.constant 0 : i32
    %c0_i32_1 = arith.constant 0 : i32
    return %c0_i32, %c0_i32_0 : i32, i32
  }
  func.func @transform_3(%arg0: i32) -> (i32, i32) {
    %c0_i32 = arith.constant 0 : i32
    %c0_i32_0 = arith.constant 0 : i32
    %c0_i32_1 = arith.constant 0 : i32
    return %c0_i32, %c0_i32_0 : i32, i32
  }
  func.func @transform_4(%arg0: i32) -> (i32, i32) {
    %c0_i32 = arith.constant 0 : i32
    %c0_i32_0 = arith.constant 0 : i32
    %c0_i32_1 = arith.constant 0 : i32
    return %c0_i32, %c0_i32_0 : i32, i32
  }
  func.func @transform_5(%arg0: i32) -> (i32, i32) {
    %c0_i32 = arith.constant 0 : i32
    %c0_i32_0 = arith.constant 0 : i32
    return %arg0, %c0_i32 : i32, i32
  }
}

</mosaic_0001>

<bundles_post_ra>
// kernel: tec_gru_forward.5
= control target key start
LH: loop header
LB: loop body
LE: loop exit
PB: predicated region body
PF: predicated region fallthrough
CT: control target
= control target key end

     0   :  { %vm31_vm0 = vcmask 130048   ;;  %v410_v52 = vmov 0.0   ;;  %v165_v60 = vlaneseq  ;;  %s623_s1 = inlined_call_operand.vmem [shape: f32[16,128], index: 1, kind: input, shape index: {}]   ;;  %s624_s0 = inlined_call_operand.vmem [shape: f32[16,16], index: 0, kind: input, shape index: {}]   ;;  %s625_s3 = inlined_call_operand.vmem [shape: f32[128,384], index: 3, kind: input, shape index: {}]   ;;  %s626_s2 = inlined_call_operand.vmem [shape: f32[1,128], index: 2, kind: input, shape index: {}]   ;;  %s627_s4 = inlined_call_operand.vmem [shape: f32[1,384], index: 4, kind: input, shape index: {}]   ;;  %s628_s5 = inlined_call_operand.vmem [shape: f32[16,384], index: 5, kind: output, shape index: {}]  }
   0x1   :  { %v23_v0 = vld [vmem:[%s623_s1 + $0x8] sm:$0xff]  ;;  %v22_v1 = vld [vmem:[%s623_s1] sm:$0xff]  ;;  %v161_v3 = vld [vmem:[%s625_s3 + $0x170] sm:$0xff]  ;;  %244 = vmatprep.mubr.f32.mxu1 %v410_v52 }
   0x2   :  { %v20_v2 = vld [vmem:[%s624_s0] sm:$0xff]  ;;  %367 = vmatprep.subr.mxu0 %v23_v0  ;;  %v160_v4 = vld [vmem:[%s625_s3 + $0x168] sm:$0xff]  ;;  %180 = vmatprep.subr.mxu1 %v161_v3  ;;  %v162_v6 = vld [vmem:[%s625_s3 + $0x178] sm:$0xff]  ;;  %v166_v61 = vshrl.u32 %v165_v60, 7 }
   0x3   :  { %371 = vmatprep.mubr.msk.f32.mxu0 %vm31_vm0, %v20_v2  ;;  %368 = vmatpush3.msra.mxu0 %v23_v0  ;;  %v21_v5 = vld [vmem:[%s624_s0 + $0x8] sm:$0xff]  ;;  %v158_v7 = vld [vmem:[%s625_s3 + $0x158] sm:$0xff]  ;;  %v157_v8 = vld [vmem:[%s625_s3 + $0x150] sm:$0xff] }
   0x4   :  { %369 = vmatprep.subr.mxu0 %v22_v1  ;;  %181 = vmatpush1.msra.mxu1 %v160_v4  ;;  %v159_v9 = vld [vmem:[%s625_s3 + $0x160] sm:$0xff]  ;;  %v154_v11 = vld [vmem:[%s625_s3 + $0x138] sm:$0xff]  ;;  %v156_v12 = vld [vmem:[%s625_s3 + $0x148] sm:$0xff]  ;;  %v167_v62 = vsub.s32 0, %v166_v61  ;;  %v175_v0 = vsub.s32 2, %v166_v61 }
   0x5   :  { %370 = vmatpush3.msra.mxu0 %v22_v1  ;;  %182 = vmatprep.subr.mxu1 %v158_v7  ;;  %v155_v10 = vld [vmem:[%s625_s3 + $0x140] sm:$0xff]  ;;  %v152_v13 = vld [vmem:[%s625_s3 + $0x128] sm:$0xff]  ;;  %v153_v15 = vld [vmem:[%s625_s3 + $0x130] sm:$0xff]  ;;  %v171_v1 = vsub.s32 1, %v166_v61 }
   0x6   :  { %372 = vmatmul.mubr.msk.f32.vlgmr.msra.gmra.mxu0 %vm31_vm0, %v21_v5  ;;  %374 = vmatprep.subr.mxu0 %v162_v6  ;;  %v151_v14 = vld [vmem:[%s625_s3 + $0x120] sm:$0xff]  ;;  %v149_v16 = vld [vmem:[%s625_s3 + $0x110] sm:$0xff]  ;;  %v148_v17 = vld [vmem:[%s625_s3 + $0x108] sm:$0xff] }
   0x7   :  { %375 = vmatpush3.msra.mxu0 %v162_v6  ;;  %183 = vmatpush1.msra.mxu1 %v157_v8  ;;  %v150_v18 = vld [vmem:[%s625_s3 + $0x118] sm:$0xff]  ;;  %v145_v20 = vld [vmem:[%s625_s3 + $0xf0] sm:$0xff]  ;;  %v147_v21 = vld [vmem:[%s625_s3 + $0x100] sm:$0xff] }
   0x8   :  { %376 = vmatprep.subr.mxu0 %v159_v9  ;;  %184 = vmatprep.subr.mxu1 %v155_v10  ;;  %v146_v19 = vld [vmem:[%s625_s3 + $0xf8] sm:$0xff]  ;;  %v143_v22 = vld [vmem:[%s625_s3 + $0xe0] sm:$0xff]  ;;  %v144_v24 = vld [vmem:[%s625_s3 + $0xe8] sm:$0xff] }
   0x9   :  { %377 = vmatpush3.msra.mxu0 %v159_v9  ;;  %185 = vmatpush1.msra.mxu1 %v154_v11  ;;  %v142_v23 = vld [vmem:[%s625_s3 + $0xd8] sm:$0xff]  ;;  %v140_v25 = vld [vmem:[%s625_s3 + $0xc8] sm:$0xff]  ;;  %v139_v26 = vld [vmem:[%s625_s3 + $0xc0] sm:$0xff] }
   0xa   :  { %378 = vmatprep.subr.mxu0 %v156_v12  ;;  %186 = vmatprep.subr.mxu1 %v152_v13  ;;  %v141_v27 = vld [vmem:[%s625_s3 + $0xd0] sm:$0xff]  ;;  %v136_v29 = vld [vmem:[%s625_s3 + $0xa8] sm:$0xff]  ;;  %v138_v30 = vld [vmem:[%s625_s3 + $0xb8] sm:$0xff] }
   0xb   :  { %379 = vmatpush3.msra.mxu0 %v156_v12  ;;  %187 = vmatpush1.msra.mxu1 %v151_v14  ;;  %v137_v28 = vld [vmem:[%s625_s3 + $0xb0] sm:$0xff]  ;;  %v134_v31 = vld [vmem:[%s625_s3 + $0x98] sm:$0xff]  ;;  %v135_v33 = vld [vmem:[%s625_s3 + $0xa0] sm:$0xff] }
   0xc   :  { %380 = vmatprep.subr.mxu0 %v153_v15  ;;  %188 = vmatprep.subr.mxu1 %v149_v16  ;;  %v133_v32 = vld [vmem:[%s625_s3 + $0x90] sm:$0xff]  ;;  %v131_v34 = vld [vmem:[%s625_s3 + $0x80] sm:$0xff]  ;;  %v130_v35 = vld [vmem:[%s625_s3 + $0x78] sm:$0xff] }
   0xd   :  { %381 = vmatpush3.msra.mxu0 %v153_v15  ;;  %189 = vmatpush1.msra.mxu1 %v148_v17  ;;  %v132_v36 = vld [vmem:[%s625_s3 + $0x88] sm:$0xff]  ;;  %v127_v38 = vld [vmem:[%s625_s3 + $0x60] sm:$0xff]  ;;  %v129_v39 = vld [vmem:[%s625_s3 + $0x70] sm:$0xff] }
   0xe   :  { %382 = vmatprep.subr.mxu0 %v150_v18  ;;  %190 = vmatprep.subr.mxu1 %v146_v19  ;;  %v128_v37 = vld [vmem:[%s625_s3 + $0x68] sm:$0xff]  ;;  %v125_v40 = vld [vmem:[%s625_s3 + $0x50] sm:$0xff]  ;;  %v126_v42 = vld [vmem:[%s625_s3 + $0x58] sm:$0xff] }
   0xf   :  { %383 = vmatpush3.msra.mxu0 %v150_v18  ;;  %191 = vmatpush1.msra.mxu1 %v145_v20  ;;  %v124_v41 = vld [vmem:[%s625_s3 + $0x48] sm:$0xff]  ;;  %v122_v43 = vld [vmem:[%s625_s3 + $0x38] sm:$0xff]  ;;  %v121_v44 = vld [vmem:[%s625_s3 + $0x30] sm:$0xff] }
  0x10   :  { %384 = vmatprep.subr.mxu0 %v147_v21  ;;  %192 = vmatprep.subr.mxu1 %v143_v22  ;;  %v123_v45 = vld [vmem:[%s625_s3 + $0x40] sm:$0xff]  ;;  %v118_v47 = vld [vmem:[%s625_s3 + $0x18] sm:$0xff]  ;;  %v120_v48 = vld [vmem:[%s625_s3 + $0x28] sm:$0xff] }
  0x11   :  { %385 = vmatpush3.msra.mxu0 %v147_v21  ;;  %193 = vmatpush1.msra.mxu1 %v142_v23  ;;  %v119_v46 = vld [vmem:[%s625_s3 + $0x20] sm:$0xff]  ;;  %v116_v49 = vld [vmem:[%s625_s3 + $0x8] sm:$0xff]  ;;  %v117_v51 = vld [vmem:[%s625_s3 + $0x10] sm:$0xff] }
  0x12   :  { %386 = vmatprep.subr.mxu0 %v144_v24  ;;  %194 = vmatprep.subr.mxu1 %v140_v25  ;;  %v115_v50 = vld [vmem:[%s625_s3] sm:$0xff] }
  0x13   :  { %387 = vmatpush3.msra.mxu0 %v144_v24  ;;  %195 = vmatpush1.msra.mxu1 %v139_v26  ;;  %v342_v53 = vld [vmem:[%s626_s2] ss:$0 sm:$0xff] }
  0x14   :  { %388 = vmatprep.subr.mxu0 %v141_v27  ;;  %196 = vmatprep.subr.mxu1 %v137_v28  ;;  %v163_v63 = vld [vmem:[%s627_s4] sm:$0x7] }
  0x15   :  { %389 = vmatpush3.msra.mxu0 %v141_v27  ;;  %197 = vmatpush1.msra.mxu1 %v136_v29  ;;  %v168_v2 = vrot.slane %v163_v63, %v167_v62  ;;  %v176_v3 = vrot.slane %v163_v63, %v175_v0  ;;  %v172_v4 = vrot.slane %v163_v63, %v171_v1 }
  0x16   :  { %390 = vmatprep.subr.mxu0 %v138_v30  ;;  %198 = vmatprep.subr.mxu1 %v134_v31 }
  0x17   :  { %391 = vmatpush3.msra.mxu0 %v138_v30  ;;  %199 = vmatpush1.msra.mxu1 %v133_v32 }
  0x18   :  { %392 = vmatprep.subr.mxu0 %v135_v33  ;;  %200 = vmatprep.subr.mxu1 %v131_v34 }
  0x19   :  { %393 = vmatpush3.msra.mxu0 %v135_v33  ;;  %201 = vmatpush1.msra.mxu1 %v130_v35 }
  0x1a   :  { %394 = vmatprep.subr.mxu0 %v132_v36  ;;  %202 = vmatprep.subr.mxu1 %v128_v37 }
  0x1b   :  { %395 = vmatpush3.msra.mxu0 %v132_v36  ;;  %203 = vmatpush1.msra.mxu1 %v127_v38 }
  0x1c   :  { %396 = vmatprep.subr.mxu0 %v129_v39  ;;  %204 = vmatprep.subr.mxu1 %v125_v40 }
  0x1d   :  { %397 = vmatpush3.msra.mxu0 %v129_v39  ;;  %205 = vmatpush1.msra.mxu1 %v124_v41 }
  0x1e   :  { %398 = vmatprep.subr.mxu0 %v126_v42  ;;  %206 = vmatprep.subr.mxu1 %v122_v43 }
  0x1f   :  { %399 = vmatpush3.msra.mxu0 %v126_v42  ;;  %207 = vmatpush1.msra.mxu1 %v121_v44 }
  0x20   :  { %400 = vmatprep.subr.mxu0 %v123_v45  ;;  %208 = vmatprep.subr.mxu1 %v119_v46 }
  0x21   :  { %401 = vmatpush3.msra.mxu0 %v123_v45  ;;  %209 = vmatpush1.msra.mxu1 %v118_v47 }
  0x22   :  { %402 = vmatprep.subr.mxu0 %v120_v48  ;;  %210 = vmatprep.subr.mxu1 %v116_v49 }
  0x23   :  { %403 = vmatpush3.msra.mxu0 %v120_v48  ;;  %211 = vmatpush1.msra.mxu1 %v115_v50 }
  0x24   :  { %404 = vmatprep.subr.mxu0 %v117_v51 }
  0x25   :  { %405 = vmatpush3.msra.mxu0 %v117_v51 }
  0xc6   :  { %v373_v54 = vpop.f32.mrf.mxu0 }
  0xc7   :  { %v110_v55 = vadd.f32 %v373_v54, %v342_v53 }
  0xc8   :  { %v104_v56 = vpop.f32.mrf.mxu0 }
  0xc9   :  { %v105_v57 = vadd.f32 %v342_v53, %v104_v56  ;;  %v114_v59 = vmax.f32 %v110_v55, 0.0 }
  0xcb   :  { %v113_v58 = vmax.f32 %v105_v57, 0.0 }
  0xcd   :  { %245 = vmatmul.mubr.f32.vlgmr.msra.gmra.mxu1 %v113_v58  ;;  %406 = vmatprep.mubr.f32.mxu0 %v113_v58 }
  0xce   :  { %407 = vmatmul.mubr.f32.vlgmr.msra.gmra.mxu0 %v114_v59  ;;  %250 = vmatprep.mubr.f32.mxu1 %v410_v52 }
  0xd1   :  { %251 = vmatmul.mubr.f32.gmra.mxu1 %v114_v59 }
 0x18d   :  { %v246_v5 = vpop.f32.mrf.mxu1 }
 0x18e   :  { %v247_v6 = vadd.f32 %v246_v5, %v168_v2  ;;  %v408_v7 = vpop.f32.mrf.mxu0 }
 0x18f   :  { %v329_v8 = vadd.f32 %v408_v7, %v176_v3  ;;  %v248_v9 = vpop.f32.mrf.mxu1 }
 0x190   :  { %332 = vst [vmem:[%s628_s5] sm:$0xff] %v247_v6  ;;  %v249_v10 = vadd.f32 %v248_v9, %v172_v4  ;;  %v323_v11 = vpop.f32.mrf.mxu0 }
 0x191   :  { %337 = vst [vmem:[%s628_s5 + $0x28] sm:$0xff] %v329_v8  ;;  %v324_v12 = vadd.f32 %v323_v11, %v176_v3  ;;  %v252_v13 = vpop.f32.mrf.mxu1 }
 0x192   :  { %333 = vst [vmem:[%s628_s5 + $0x8] sm:$0xff] %v249_v10  ;;  %v253_v14 = vadd.f32 %v252_v13, %v168_v2 }
 0x193   :  { %334 = vst [vmem:[%s628_s5 + $0x10] sm:$0xff] %v324_v12  ;;  %v254_v15 = vpop.f32.mrf.mxu1 }
 0x194   :  { %335 = vst [vmem:[%s628_s5 + $0x18] sm:$0xff] %v253_v14  ;;  %v255_v16 = vadd.f32 %v254_v15, %v172_v4 }
 0x196   :  { %336 = vst [vmem:[%s628_s5 + $0x20] sm:$0xff] %v255_v16 }

// kernel: tec_gru_forward.7
= control target key start
LH: loop header
LB: loop body
LE: loop exit
PB: predicated region body
PF: predicated region fallthrough
CT: control target
= control target key end

     0   :  { %v352_v56 = vmov 0.0   ;;  %s570_s0 = inlined_call_operand.vmem [shape: f32[16,128], index: 0, kind: input, shape index: {}]   ;;  %s571_s3 = inlined_call_operand.vmem [shape: f32[128,384], index: 3, kind: input, shape index: {}]   ;;  %s572_s1 = inlined_call_operand.vmem [shape: f32[1,128], index: 1, kind: input, shape index: {}]   ;;  %s573_s2 = inlined_call_operand.vmem [shape: f32[1,128], index: 2, kind: input, shape index: {}]   ;;  %s574_s4 = inlined_call_operand.vmem [shape: f32[1,384], index: 4, kind: input, shape index: {}]   ;;  %s575_s5 = inlined_call_operand.vmem [shape: f32[16,384], index: 5, kind: output, shape index: {}]  }
   0x1   :  { %v20_v0 = vld [vmem:[%s570_s0] sm:$0xff]  ;;  %v21_v1 = vld [vmem:[%s570_s0 + $0x8] sm:$0xff]  ;;  %v111_v2 = vld [vmem:[%s571_s3 + $0x170] sm:$0xff]  ;;  %194 = vmatprep.mubr.f32.mxu0 %v352_v56 }
   0x2   :  { %22 = vadd.xlane.f32.xlu0 %v20_v0  ;;  %v110_v3 = vld [vmem:[%s571_s3 + $0x168] sm:$0xff]  ;;  %v108_v4 = vld [vmem:[%s571_s3 + $0x158] sm:$0xff]  ;;  %130 = vmatprep.subr.mxu0 %v111_v2  ;;  %v107_v5 = vld [vmem:[%s571_s3 + $0x150] sm:$0xff] }
   0x3   :  { %v112_v6 = vld [vmem:[%s571_s3 + $0x178] sm:$0xff]  ;;  %131 = vmatpush1.msra.mxu0 %v110_v3  ;;  %v105_v7 = vld [vmem:[%s571_s3 + $0x140] sm:$0xff]  ;;  %v102_v17 = vld [vmem:[%s571_s3 + $0x128] sm:$0xff] }
   0x4   :  { %312 = vmatprep.subr.mxu1 %v112_v6  ;;  %132 = vmatprep.subr.mxu0 %v108_v4  ;;  %v104_v8 = vld [vmem:[%s571_s3 + $0x138] sm:$0xff]  ;;  %v109_v18 = vld [vmem:[%s571_s3 + $0x160] sm:$0xff]  ;;  %v99_v20 = vld [vmem:[%s571_s3 + $0x110] sm:$0xff] }
   0x5   :  { %313 = vmatpush3.msra.mxu1 %v112_v6  ;;  %133 = vmatpush1.msra.mxu0 %v107_v5  ;;  %v101_v19 = vld [vmem:[%s571_s3 + $0x120] sm:$0xff]  ;;  %v106_v21 = vld [vmem:[%s571_s3 + $0x148] sm:$0xff]  ;;  %v96_v23 = vld [vmem:[%s571_s3 + $0xf8] sm:$0xff] }
   0x6   :  { %24 = vadd.xlane.f32.xlu0 %v21_v1  ;;  %134 = vmatprep.subr.mxu0 %v105_v7  ;;  %v98_v22 = vld [vmem:[%s571_s3 + $0x108] sm:$0xff]  ;;  %v103_v24 = vld [vmem:[%s571_s3 + $0x130] sm:$0xff]  ;;  %v93_v26 = vld [vmem:[%s571_s3 + $0xe0] sm:$0xff] }
   0x7   :  { %135 = vmatpush1.msra.mxu0 %v104_v8  ;;  %314 = vmatprep.subr.mxu1 %v109_v18  ;;  %v95_v25 = vld [vmem:[%s571_s3 + $0xf0] sm:$0xff]  ;;  %v100_v27 = vld [vmem:[%s571_s3 + $0x118] sm:$0xff]  ;;  %v90_v29 = vld [vmem:[%s571_s3 + $0xc8] sm:$0xff] }
   0x8   :  { %136 = vmatprep.subr.mxu0 %v102_v17  ;;  %315 = vmatpush3.msra.mxu1 %v109_v18  ;;  %v92_v28 = vld [vmem:[%s571_s3 + $0xd8] sm:$0xff]  ;;  %v97_v30 = vld [vmem:[%s571_s3 + $0x100] sm:$0xff]  ;;  %v87_v32 = vld [vmem:[%s571_s3 + $0xb0] sm:$0xff] }
   0x9   :  { %137 = vmatpush1.msra.mxu0 %v101_v19  ;;  %316 = vmatprep.subr.mxu1 %v106_v21  ;;  %v89_v31 = vld [vmem:[%s571_s3 + $0xc0] sm:$0xff]  ;;  %v94_v33 = vld [vmem:[%s571_s3 + $0xe8] sm:$0xff]  ;;  %v84_v35 = vld [vmem:[%s571_s3 + $0x98] sm:$0xff] }
   0xa   :  { %138 = vmatprep.subr.mxu0 %v99_v20  ;;  %317 = vmatpush3.msra.mxu1 %v106_v21  ;;  %v86_v34 = vld [vmem:[%s571_s3 + $0xa8] sm:$0xff]  ;;  %v91_v36 = vld [vmem:[%s571_s3 + $0xd0] sm:$0xff]  ;;  %v81_v38 = vld [vmem:[%s571_s3 + $0x80] sm:$0xff] }
   0xb   :  { %139 = vmatpush1.msra.mxu0 %v98_v22  ;;  %318 = vmatprep.subr.mxu1 %v103_v24  ;;  %v83_v37 = vld [vmem:[%s571_s3 + $0x90] sm:$0xff]  ;;  %v88_v39 = vld [vmem:[%s571_s3 + $0xb8] sm:$0xff]  ;;  %v78_v41 = vld [vmem:[%s571_s3 + $0x68] sm:$0xff] }
   0xc   :  { %140 = vmatprep.subr.mxu0 %v96_v23  ;;  %319 = vmatpush3.msra.mxu1 %v103_v24  ;;  %v80_v40 = vld [vmem:[%s571_s3 + $0x78] sm:$0xff]  ;;  %v85_v42 = vld [vmem:[%s571_s3 + $0xa0] sm:$0xff]  ;;  %v75_v44 = vld [vmem:[%s571_s3 + $0x50] sm:$0xff] }
   0xd   :  { %141 = vmatpush1.msra.mxu0 %v95_v25  ;;  %320 = vmatprep.subr.mxu1 %v100_v27  ;;  %v77_v43 = vld [vmem:[%s571_s3 + $0x60] sm:$0xff]  ;;  %v82_v45 = vld [vmem:[%s571_s3 + $0x88] sm:$0xff]  ;;  %v72_v47 = vld [vmem:[%s571_s3 + $0x38] sm:$0xff] }
   0xe   :  { %142 = vmatprep.subr.mxu0 %v93_v26  ;;  %321 = vmatpush3.msra.mxu1 %v100_v27  ;;  %v74_v46 = vld [vmem:[%s571_s3 + $0x48] sm:$0xff]  ;;  %v79_v48 = vld [vmem:[%s571_s3 + $0x70] sm:$0xff]  ;;  %v69_v50 = vld [vmem:[%s571_s3 + $0x20] sm:$0xff] }
   0xf   :  { %143 = vmatpush1.msra.mxu0 %v92_v28  ;;  %322 = vmatprep.subr.mxu1 %v97_v30  ;;  %v71_v49 = vld [vmem:[%s571_s3 + $0x30] sm:$0xff]  ;;  %v76_v51 = vld [vmem:[%s571_s3 + $0x58] sm:$0xff]  ;;  %v66_v53 = vld [vmem:[%s571_s3 + $0x8] sm:$0xff] }
  0x10   :  { %144 = vmatprep.subr.mxu0 %v90_v29  ;;  %323 = vmatpush3.msra.mxu1 %v97_v30  ;;  %v68_v52 = vld [vmem:[%s571_s3 + $0x18] sm:$0xff]  ;;  %v73_v54 = vld [vmem:[%s571_s3 + $0x40] sm:$0xff]  ;;  %v70_v57 = vld [vmem:[%s571_s3 + $0x28] sm:$0xff] }
  0x11   :  { %145 = vmatpush1.msra.mxu0 %v89_v31  ;;  %324 = vmatprep.subr.mxu1 %v94_v33  ;;  %v65_v55 = vld [vmem:[%s571_s3] sm:$0xff]  ;;  %v67_v58 = vld [vmem:[%s571_s3 + $0x10] sm:$0xff] }
  0x12   :  { %146 = vmatprep.subr.mxu0 %v87_v32  ;;  %325 = vmatpush3.msra.mxu1 %v94_v33  ;;  %v292_v2 = vld [vmem:[%s572_s1] ss:$0 sm:$0xff] }
  0x13   :  { %147 = vmatpush1.msra.mxu0 %v86_v34  ;;  %326 = vmatprep.subr.mxu1 %v91_v36  ;;  %v293_v4 = vld [vmem:[%s573_s2] ss:$0 sm:$0xff] }
  0x14   :  { %148 = vmatprep.subr.mxu0 %v84_v35  ;;  %327 = vmatpush3.msra.mxu1 %v91_v36  ;;  %v113_v17 = vld [vmem:[%s574_s4] sm:$0x7] }
  0x15   :  { %149 = vmatpush1.msra.mxu0 %v83_v37  ;;  %328 = vmatprep.subr.mxu1 %v88_v39 }
  0x16   :  { %150 = vmatprep.subr.mxu0 %v81_v38  ;;  %329 = vmatpush3.msra.mxu1 %v88_v39 }
  0x17   :  { %151 = vmatpush1.msra.mxu0 %v80_v40  ;;  %330 = vmatprep.subr.mxu1 %v85_v42 }
  0x18   :  { %152 = vmatprep.subr.mxu0 %v78_v41  ;;  %331 = vmatpush3.msra.mxu1 %v85_v42 }
  0x19   :  { %153 = vmatpush1.msra.mxu0 %v77_v43  ;;  %332 = vmatprep.subr.mxu1 %v82_v45 }
  0x1a   :  { %154 = vmatprep.subr.mxu0 %v75_v44  ;;  %333 = vmatpush3.msra.mxu1 %v82_v45 }
  0x1b   :  { %155 = vmatpush1.msra.mxu0 %v74_v46  ;;  %334 = vmatprep.subr.mxu1 %v79_v48 }
  0x1c   :  { %156 = vmatprep.subr.mxu0 %v72_v47  ;;  %335 = vmatpush3.msra.mxu1 %v79_v48 }
  0x1d   :  { %157 = vmatpush1.msra.mxu0 %v71_v49  ;;  %336 = vmatprep.subr.mxu1 %v76_v51 }
  0x1e   :  { %158 = vmatprep.subr.mxu0 %v69_v50  ;;  %337 = vmatpush3.msra.mxu1 %v76_v51 }
  0x1f   :  { %159 = vmatpush1.msra.mxu0 %v68_v52  ;;  %338 = vmatprep.subr.mxu1 %v73_v54 }
  0x20   :  { %160 = vmatprep.subr.mxu0 %v66_v53  ;;  %339 = vmatpush3.msra.mxu1 %v73_v54 }
  0x21   :  { %161 = vmatpush1.msra.mxu0 %v65_v55  ;;  %340 = vmatprep.subr.mxu1 %v70_v57 }
  0x22   :  { %341 = vmatpush3.msra.mxu1 %v70_v57 }
  0x23   :  { %342 = vmatprep.subr.mxu1 %v67_v58 }
  0x24   :  { %343 = vmatpush3.msra.mxu1 %v67_v58 }
  0x8b   :  { %v23_v9 = vpop.xlane.xlu0 %22 }
  0x8c   :  { %v27_v10 = vmul.f32 0.0078125, %v23_v9 }
  0x8e   :  { %v410_v11 = vsub.f32 %v20_v0, %v27_v10 }
  0x8f   :  { %v25_v12 = vpop.xlane.xlu0 %24 }
  0x90   :  { %v28_v13 = vmul.f32 0.0078125, %v25_v12  ;;  %v31_v14 = vmul.f32 %v410_v11, %v410_v11 }
  0x92   :  { %v414_v15 = vsub.f32 %v21_v1, %v28_v13  ;;  %33 = vadd.xlane.f32.xlu1 %v31_v14  ;;  %v115_v14 = vlaneseq }
  0x94   :  { %v32_v16 = vmul.f32 %v414_v15, %v414_v15 }
  0x96   :  { %35 = vadd.xlane.f32.xlu1 %v32_v16 }
 0x11b   :  { %v34_v59 = vpop.xlane.xlu1 %33 }
 0x11c   :  { %v37_v60 = vmul.f32 0.0078125, %v34_v59 }
 0x11e   :  { %v39_v61 = vadd.f32 1e-05, %v37_v60 }
 0x11f   :  { %v36_v62 = vpop.xlane.xlu1 %35 }
 0x120   :  { %348 = vrsqrt.f32 %v39_v61  ;;  %v38_v63 = vmul.f32 0.0078125, %v36_v62 }
 0x122   :  { %v40_v0 = vadd.f32 1e-05, %v38_v63 }
 0x124   :  { %350 = vrsqrt.f32 %v40_v0 }
 0x12d   :  { %v349_v1 = vpop.eup %348 }
 0x12e   :  { %v43_v3 = vmul.f32 %v349_v1, %v410_v11  ;;  %v116_v11 = vshrl.u32 %v115_v14, 7 }
 0x130   :  { %v52_v5 = vmul.f32 %v292_v2, %v43_v3  ;;  %v117_v16 = vsub.s32 0, %v116_v11  ;;  %v121_v18 = vsub.s32 1, %v116_v11  ;;  %v125_v20 = vsub.s32 2, %v116_v11 }
 0x131   :  { %v351_v6 = vpop.eup %350 }
 0x132   :  { %v61_v7 = vadd.f32 %v293_v4, %v52_v5  ;;  %v44_v8 = vmul.f32 %v351_v6, %v414_v15  ;;  %v118_v19 = vrot.slane %v113_v17, %v117_v16  ;;  %v122_v15 = vrot.slane %v113_v17, %v121_v18 }
 0x133   :  { %v126_v23 = vrot.slane %v113_v17, %v125_v20 }
 0x134   :  { %v63_v9 = vmax.f32 %v61_v7, 0.0  ;;  %v53_v10 = vmul.f32 %v292_v2, %v44_v8 }
 0x136   :  { %195 = vmatmul.mubr.f32.vlgmr.msra.gmra.mxu0 %v63_v9  ;;  %344 = vmatprep.mubr.f32.mxu1 %v63_v9  ;;  %v62_v12 = vadd.f32 %v293_v4, %v53_v10 }
 0x137   :  { %200 = vmatprep.mubr.f32.mxu0 %v352_v56 }
 0x138   :  { %v64_v13 = vmax.f32 %v62_v12, 0.0 }
 0x13a   :  { %201 = vmatmul.mubr.f32.gmra.mxu0 %v64_v13  ;;  %345 = vmatmul.mubr.f32.vlgmr.msra.gmra.mxu1 %v64_v13 }
 0x1f6   :  { %v196_v21 = vpop.f32.mrf.mxu0 }
 0x1f7   :  { %v197_v22 = vadd.f32 %v196_v21, %v118_v19 }
 0x1f8   :  { %v198_v24 = vpop.f32.mrf.mxu0 }
 0x1f9   :  { %282 = vst [vmem:[%s575_s5] sm:$0xff] %v197_v22  ;;  %v199_v25 = vadd.f32 %v198_v24, %v122_v15 }
 0x1fa   :  { %v202_v26 = vpop.f32.mrf.mxu0  ;;  %v346_v27 = vpop.f32.mrf.mxu1 }
 0x1fb   :  { %283 = vst [vmem:[%s575_s5 + $0x8] sm:$0xff] %v199_v25  ;;  %v203_v28 = vadd.f32 %v202_v26, %v118_v19  ;;  %v279_v29 = vadd.f32 %v346_v27, %v126_v23 }
 0x1fc   :  { %v204_v30 = vpop.f32.mrf.mxu0  ;;  %v273_v31 = vpop.f32.mrf.mxu1 }
 0x1fd   :  { %285 = vst [vmem:[%s575_s5 + $0x18] sm:$0xff] %v203_v28  ;;  %287 = vst [vmem:[%s575_s5 + $0x28] sm:$0xff] %v279_v29  ;;  %v205_v32 = vadd.f32 %v204_v30, %v122_v15  ;;  %v274_v33 = vadd.f32 %v273_v31, %v126_v23 }
 0x1ff   :  { %286 = vst [vmem:[%s575_s5 + $0x20] sm:$0xff] %v205_v32  ;;  %284 = vst [vmem:[%s575_s5 + $0x10] sm:$0xff] %v274_v33 }

// kernel: tec_gru_forward.9
= control target key start
LH: loop header
LB: loop body
LE: loop exit
PB: predicated region body
PF: predicated region fallthrough
CT: control target
= control target key end

     0   :  { %s340_s0 = inlined_call_operand.vmem [shape: f32[16,128], index: 0, kind: input, shape index: {}]   ;;  %s341_s3 = inlined_call_operand.vmem [shape: f32[128,128], index: 3, kind: input, shape index: {}]   ;;  %s342_s1 = inlined_call_operand.vmem [shape: f32[1,128], index: 1, kind: input, shape index: {}]   ;;  %s343_s2 = inlined_call_operand.vmem [shape: f32[1,128], index: 2, kind: input, shape index: {}]   ;;  %s344_s4 = inlined_call_operand.vmem [shape: f32[1,128], index: 4, kind: input, shape index: {}]   ;;  %s345_s5 = inlined_call_operand.vmem [shape: f32[16,128], index: 5, kind: output, shape index: {}]  }
   0x1   :  { %v20_v0 = vld [vmem:[%s340_s0] sm:$0xff]  ;;  %v21_v1 = vld [vmem:[%s340_s0 + $0x8] sm:$0xff]  ;;  %v80_v2 = vld [vmem:[%s341_s3 + $0x78] sm:$0xff] }
   0x2   :  { %22 = vadd.xlane.f32.xlu0 %v20_v0  ;;  %192 = vmatprep.subr.mxu0 %v80_v2  ;;  %v79_v11 = vld [vmem:[%s341_s3 + $0x70] sm:$0xff]  ;;  %v78_v12 = vld [vmem:[%s341_s3 + $0x68] sm:$0xff]  ;;  %v77_v13 = vld [vmem:[%s341_s3 + $0x60] sm:$0xff] }
   0x3   :  { %193 = vmatpush3.msra.mxu0 %v80_v2  ;;  %v76_v14 = vld [vmem:[%s341_s3 + $0x58] sm:$0xff]  ;;  %v75_v15 = vld [vmem:[%s341_s3 + $0x50] sm:$0xff]  ;;  %v74_v16 = vld [vmem:[%s341_s3 + $0x48] sm:$0xff] }
   0x4   :  { %194 = vmatprep.subr.mxu0 %v79_v11  ;;  %v73_v17 = vld [vmem:[%s341_s3 + $0x40] sm:$0xff]  ;;  %v72_v18 = vld [vmem:[%s341_s3 + $0x38] sm:$0xff]  ;;  %v71_v19 = vld [vmem:[%s341_s3 + $0x30] sm:$0xff] }
   0x5   :  { %195 = vmatpush3.msra.mxu0 %v79_v11  ;;  %v70_v20 = vld [vmem:[%s341_s3 + $0x28] sm:$0xff]  ;;  %v69_v21 = vld [vmem:[%s341_s3 + $0x20] sm:$0xff]  ;;  %v68_v22 = vld [vmem:[%s341_s3 + $0x18] sm:$0xff] }
   0x6   :  { %24 = vadd.xlane.f32.xlu0 %v21_v1  ;;  %196 = vmatprep.subr.mxu0 %v78_v12  ;;  %v67_v23 = vld [vmem:[%s341_s3 + $0x10] sm:$0xff]  ;;  %v66_v24 = vld [vmem:[%s341_s3 + $0x8] sm:$0xff]  ;;  %v65_v25 = vld [vmem:[%s341_s3] sm:$0xff] }
   0x7   :  { %197 = vmatpush3.msra.mxu0 %v78_v12  ;;  %v171_v33 = vld [vmem:[%s342_s1] ss:$0 sm:$0xff] }
   0x8   :  { %198 = vmatprep.subr.mxu0 %v77_v13  ;;  %v172_v35 = vld [vmem:[%s343_s2] ss:$0 sm:$0xff] }
   0x9   :  { %199 = vmatpush3.msra.mxu0 %v77_v13  ;;  %v173_v44 = vld [vmem:[%s344_s4] ss:$0 sm:$0xff] }
   0xa   :  { %200 = vmatprep.subr.mxu0 %v76_v14 }
   0xb   :  { %201 = vmatpush3.msra.mxu0 %v76_v14 }
   0xc   :  { %202 = vmatprep.subr.mxu0 %v75_v15 }
   0xd   :  { %203 = vmatpush3.msra.mxu0 %v75_v15 }
   0xe   :  { %204 = vmatprep.subr.mxu0 %v74_v16 }
   0xf   :  { %205 = vmatpush3.msra.mxu0 %v74_v16 }
  0x10   :  { %206 = vmatprep.subr.mxu0 %v73_v17 }
  0x11   :  { %207 = vmatpush3.msra.mxu0 %v73_v17 }
  0x12   :  { %208 = vmatprep.subr.mxu0 %v72_v18 }
  0x13   :  { %209 = vmatpush3.msra.mxu0 %v72_v18 }
  0x14   :  { %210 = vmatprep.subr.mxu0 %v71_v19 }
  0x15   :  { %211 = vmatpush3.msra.mxu0 %v71_v19 }
  0x16   :  { %212 = vmatprep.subr.mxu0 %v70_v20 }
  0x17   :  { %213 = vmatpush3.msra.mxu0 %v70_v20 }
  0x18   :  { %214 = vmatprep.subr.mxu0 %v69_v21 }
  0x19   :  { %215 = vmatpush3.msra.mxu0 %v69_v21 }
  0x1a   :  { %216 = vmatprep.subr.mxu0 %v68_v22 }
  0x1b   :  { %217 = vmatpush3.msra.mxu0 %v68_v22 }
  0x1c   :  { %218 = vmatprep.subr.mxu0 %v67_v23 }
  0x1d   :  { %219 = vmatpush3.msra.mxu0 %v67_v23 }
  0x1e   :  { %220 = vmatprep.subr.mxu0 %v66_v24 }
  0x1f   :  { %221 = vmatpush3.msra.mxu0 %v66_v24 }
  0x20   :  { %222 = vmatprep.subr.mxu0 %v65_v25 }
  0x21   :  { %223 = vmatpush3.msra.mxu0 %v65_v25 }
  0x8b   :  { %v23_v3 = vpop.xlane.xlu0 %22 }
  0x8c   :  { %v27_v4 = vmul.f32 0.0078125, %v23_v3 }
  0x8e   :  { %v270_v5 = vsub.f32 %v20_v0, %v27_v4 }
  0x8f   :  { %v25_v6 = vpop.xlane.xlu0 %24 }
  0x90   :  { %v28_v7 = vmul.f32 0.0078125, %v25_v6  ;;  %v31_v8 = vmul.f32 %v270_v5, %v270_v5 }
  0x92   :  { %v274_v9 = vsub.f32 %v21_v1, %v28_v7  ;;  %33 = vadd.xlane.f32.xlu1 %v31_v8 }
  0x94   :  { %v32_v10 = vmul.f32 %v274_v9, %v274_v9 }
  0x96   :  { %35 = vadd.xlane.f32.xlu1 %v32_v10 }
 0x11b   :  { %v34_v26 = vpop.xlane.xlu1 %33 }
 0x11c   :  { %v37_v27 = vmul.f32 0.0078125, %v34_v26 }
 0x11e   :  { %v39_v28 = vadd.f32 1e-05, %v37_v27 }
 0x11f   :  { %v36_v29 = vpop.xlane.xlu1 %35 }
 0x120   :  { %227 = vrsqrt.f32 %v39_v28  ;;  %v38_v30 = vmul.f32 0.0078125, %v36_v29 }
 0x122   :  { %v40_v31 = vadd.f32 1e-05, %v38_v30 }
 0x124   :  { %229 = vrsqrt.f32 %v40_v31 }
 0x12d   :  { %v228_v32 = vpop.eup %227 }
 0x12e   :  { %v43_v34 = vmul.f32 %v228_v32, %v270_v5 }
 0x130   :  { %v52_v36 = vmul.f32 %v171_v33, %v43_v34 }
 0x131   :  { %v230_v37 = vpop.eup %229 }
 0x132   :  { %v44_v38 = vmul.f32 %v230_v37, %v274_v9  ;;  %v61_v39 = vadd.f32 %v172_v35, %v52_v36 }
 0x134   :  { %v53_v40 = vmul.f32 %v171_v33, %v44_v38  ;;  %v63_v41 = vmax.f32 %v61_v39, 0.0 }
 0x136   :  { %v62_v42 = vadd.f32 %v172_v35, %v53_v40  ;;  %224 = vmatprep.mubr.f32.mxu0 %v63_v41 }
 0x138   :  { %v64_v43 = vmax.f32 %v62_v42, 0.0 }
 0x13a   :  { %225 = vmatmul.mubr.f32.vlgmr.msra.gmra.mxu0 %v64_v43 }
 0x1fa   :  { %v226_v45 = vpop.f32.mrf.mxu0 }
 0x1fb   :  { %v160_v46 = vadd.f32 %v226_v45, %v173_v44 }
 0x1fc   :  { %v154_v47 = vpop.f32.mrf.mxu0 }
 0x1fd   :  { %v164_v48 = vmax.f32 %v160_v46, 0.0  ;;  %v155_v49 = vadd.f32 %v173_v44, %v154_v47 }
 0x1ff   :  { %166 = vst [vmem:[%s345_s5 + $0x8] sm:$0xff] %v164_v48  ;;  %v163_v50 = vmax.f32 %v155_v49, 0.0 }
 0x201   :  { %165 = vst [vmem:[%s345_s5] sm:$0xff] %v163_v50 }

// kernel: tec_gru_forward.6
= control target key start
LH: loop header
LB: loop body
LE: loop exit
PB: predicated region body
PF: predicated region fallthrough
CT: control target
= control target key end

     0   :  { %v468_v0 = vmov 0.0   ;;  %s738_s29 = smov 0   ;;  %s841_s0 = inlined_call_operand.vmem [shape: f32[8,2,384], index: 0, kind: input, shape index: {}]   ;;  %s842_s1 = inlined_call_operand.vmem [shape: f32[128,384], index: 1, kind: input, shape index: {}]   ;;  %s843_s3 = inlined_call_operand.vmem [shape: f32[8,2,128], index: 3, kind: output, shape index: {}]   ;;  %s844_s2 = inlined_call_operand.vmem [shape: f32[1,384], index: 2, kind: input, shape index: {}]  }
   0x1   :  { %14 = vst [vmem:[#allocation2] sm:$0x3] %v468_v0  ;;  %v496_v1 = vld [vmem:[%s842_s1] sm:$0xff]  ;;  %v501_v2 = vld [vmem:[%s842_s1 + $0x8] sm:$0xff]  ;;  %v506_v3 = vld [vmem:[%s842_s1 + $0x10] sm:$0xff] }
   0x2   :  { %845 = vst [vmem:[#allocation3_spill] sm:$0xff] %v496_v1  ;;  %846 = vst [vmem:[#allocation4_spill] sm:$0xff] %v501_v2  ;;  %v511_v4 = vld [vmem:[%s842_s1 + $0x18] sm:$0xff]  ;;  %v516_v5 = vld [vmem:[%s842_s1 + $0x20] sm:$0xff] }
   0x3   :  { %847 = vst [vmem:[#allocation5_spill] sm:$0xff] %v506_v3  ;;  %848 = vst [vmem:[#allocation6_spill] sm:$0xff] %v511_v4  ;;  %v521_v6 = vld [vmem:[%s842_s1 + $0x28] sm:$0xff]  ;;  %v526_v7 = vld [vmem:[%s842_s1 + $0x30] sm:$0xff] }
   0x4   :  { %849 = vst [vmem:[#allocation7_spill] sm:$0xff] %v516_v5  ;;  %850 = vst [vmem:[#allocation8_spill] sm:$0xff] %v521_v6  ;;  %v531_v8 = vld [vmem:[%s842_s1 + $0x38] sm:$0xff]  ;;  %v536_v9 = vld [vmem:[%s842_s1 + $0x40] sm:$0xff] }
   0x5   :  { %851 = vst [vmem:[#allocation9_spill] sm:$0xff] %v526_v7  ;;  %852 = vst [vmem:[#allocation10_spill] sm:$0xff] %v531_v8  ;;  %v541_v10 = vld [vmem:[%s842_s1 + $0x48] sm:$0xff]  ;;  %v546_v11 = vld [vmem:[%s842_s1 + $0x50] sm:$0xff] }
   0x6   :  { %853 = vst [vmem:[#allocation11_spill] sm:$0xff] %v536_v9  ;;  %854 = vst [vmem:[#allocation12_spill] sm:$0xff] %v541_v10  ;;  %v551_v12 = vld [vmem:[%s842_s1 + $0x58] sm:$0xff]  ;;  %v556_v13 = vld [vmem:[%s842_s1 + $0x60] sm:$0xff] }
   0x7   :  { %v561_v14 = vld [vmem:[%s842_s1 + $0x68] sm:$0xff]  ;;  %v566_v15 = vld [vmem:[%s842_s1 + $0x70] sm:$0xff]  ;;  %v571_v16 = vld [vmem:[%s842_s1 + $0x78] sm:$0xff] }
   0x8   :  { %v576_v17 = vld [vmem:[%s842_s1 + $0x80] sm:$0xff]  ;;  %v581_v18 = vld [vmem:[%s842_s1 + $0x88] sm:$0xff]  ;;  %v586_v19 = vld [vmem:[%s842_s1 + $0x90] sm:$0xff] }
   0x9   :  { %v591_v20 = vld [vmem:[%s842_s1 + $0x98] sm:$0xff]  ;;  %v596_v21 = vld [vmem:[%s842_s1 + $0xa0] sm:$0xff]  ;;  %v601_v22 = vld [vmem:[%s842_s1 + $0xa8] sm:$0xff] }
   0xa   :  { %v606_v23 = vld [vmem:[%s842_s1 + $0xb0] sm:$0xff]  ;;  %v611_v24 = vld [vmem:[%s842_s1 + $0xb8] sm:$0xff]  ;;  %v616_v25 = vld [vmem:[%s842_s1 + $0xc0] sm:$0xff] }
   0xb   :  { %v621_v26 = vld [vmem:[%s842_s1 + $0xc8] sm:$0xff]  ;;  %v626_v27 = vld [vmem:[%s842_s1 + $0xd0] sm:$0xff]  ;;  %v631_v28 = vld [vmem:[%s842_s1 + $0xd8] sm:$0xff] }
   0xc   :  { %v636_v29 = vld [vmem:[%s842_s1 + $0xe0] sm:$0xff]  ;;  %v641_v30 = vld [vmem:[%s842_s1 + $0xe8] sm:$0xff]  ;;  %v646_v31 = vld [vmem:[%s842_s1 + $0xf0] sm:$0xff] }
   0xd   :  { %v651_v32 = vld [vmem:[%s842_s1 + $0xf8] sm:$0xff]  ;;  %v656_v33 = vld [vmem:[%s842_s1 + $0x100] sm:$0xff]  ;;  %v661_v34 = vld [vmem:[%s842_s1 + $0x108] sm:$0xff] }
   0xe   :  { %v666_v35 = vld [vmem:[%s842_s1 + $0x110] sm:$0xff]  ;;  %v671_v36 = vld [vmem:[%s842_s1 + $0x118] sm:$0xff]  ;;  %v676_v37 = vld [vmem:[%s842_s1 + $0x120] sm:$0xff] }
   0xf   :  { %v681_v38 = vld [vmem:[%s842_s1 + $0x128] sm:$0xff]  ;;  %v686_v39 = vld [vmem:[%s842_s1 + $0x130] sm:$0xff]  ;;  %v691_v40 = vld [vmem:[%s842_s1 + $0x138] sm:$0xff] }
  0x10   :  { %v696_v41 = vld [vmem:[%s842_s1 + $0x140] sm:$0xff]  ;;  %v701_v42 = vld [vmem:[%s842_s1 + $0x148] sm:$0xff]  ;;  %v706_v43 = vld [vmem:[%s842_s1 + $0x150] sm:$0xff] }
  0x11   :  { %v711_v44 = vld [vmem:[%s842_s1 + $0x158] sm:$0xff]  ;;  %v716_v45 = vld [vmem:[%s842_s1 + $0x160] sm:$0xff]  ;;  %v721_v46 = vld [vmem:[%s842_s1 + $0x168] sm:$0xff] }
  0x12   :  { %v726_v47 = vld [vmem:[%s842_s1 + $0x170] sm:$0xff]  ;;  %v731_v48 = vld [vmem:[%s842_s1 + $0x178] sm:$0xff]  ;;  %v736_v49 = vld [vmem:[%s844_s2] sm:$0x7] }
  0x13 LB: > { %87 = vmatprep.subr.mxu0 %v726_v47  ;;  %v469_v50 = vmov 0.0   ;;  %v855_v10 = vld [vmem:[#allocation12_spill] sm:$0xff]  ;;  %v856_v8 = vld [vmem:[#allocation10_spill] sm:$0xff]  ;;  %v857_v7 = vld [vmem:[#allocation9_spill] sm:$0xff]  ;;  %vm470_vm0 = vmmov 0   ;;  %s232_s1 = ssub.s32 7, %s466_s29  ;;  %v72_v53 = vlaneseq  ;;  %s466_s29 = sphi %s738_s29, %s69_s29  }
  0x14   : > { %88 = vmatpush1.msra.mxu0 %v721_v46  ;;  %151 = vmatprep.mubr.f32.mxu0 %v469_v50  ;;  %v858_v5 = vld [vmem:[#allocation7_spill] sm:$0xff]  ;;  %v859_v4 = vld [vmem:[#allocation6_spill] sm:$0xff]  ;;  %v861_v2 = vld [vmem:[#allocation4_spill] sm:$0xff]  ;;  %s378_s2 = smul.u32 6, %s232_s1  ;;  %s471_s6 = smov 64   ;;  %vm332_vm1 = vcmask 517120  }
  0x15   : > { %89 = vmatprep.subr.mxu0 %v711_v44  ;;  %396 = vmatprep.subr.mxu1 %v469_v50  ;;  %v70_v51 = vld [vmem:[#allocation2] sm:$0x3]  ;;  %v860_v9 = vld [vmem:[#allocation11_spill] sm:$0xff]  ;;  %v863_v6 = vld [vmem:[#allocation8_spill] sm:$0xff]  ;;  %v73_v54 = vshrl.u32 %v72_v53, 7  ;;  %s377_s7 = smul.u32 6, %s466_s29 }
  0x16   : > { %90 = vmatpush1.msra.mxu0 %v706_v43  ;;  %397 = vmatpush3.msra.mxu1 %v731_v48  ;;  %v862_v1 = vld [vmem:[#allocation3_spill] sm:$0xff]  ;;  %v864_v3 = vld [vmem:[#allocation5_spill] sm:$0xff]  ;;  %s235_s5 = scalar_lea.vmem %s841_s0, %s378_s2  ;;  %v472_v56 = vmov 1983009808   ;;  %s375_s11 = sshll.u32 %s466_s29, 1  ;;  %vm345_vm2 = vcmask 1041920  }
  0x17   : > { %91 = vmatprep.subr.mxu0 %v696_v41  ;;  %398 = vmatprep.subr.mxu1 %v469_v50  ;;  %v236_v52 = vld [vmem:[%s235_s5] sm:$0x3f]  ;;  %v74_v55 = vsub.s32 0, %v73_v54  ;;  %v258_v57 = vunpack.c.l.s4 %v472_v56  ;;  %v78_v58 = vsub.s32 1, %v73_v54  ;;  %v82_v59 = vsub.s32 2, %v73_v54  ;;  %s230_s10 = scalar_lea.vmem %s841_s0, %s377_s7  ;;  %s348_s14 = scalar_lea.vmem %s843_s3, %s375_s11 }
  0x18   : > { %92 = vmatpush1.msra.mxu0 %v691_v40  ;;  %399 = vmatpush3.msra.mxu1 %v716_v45  ;;  %s376_s15 = sshll.u32 %s232_s1, 1  ;;  %s69_s29 = sadd.s32 1, %s466_s29  }
  0x19   : > { %93 = vmatprep.subr.mxu0 %v681_v38  ;;  %400 = vmatprep.subr.mxu1 %v469_v50  ;;  %v75_v60 = vrot.slane %v736_v49, %v74_v55  ;;  %v259_v61 = vunpack.c.0.s8 %v258_v57  ;;  %v79_v62 = vrot.slane %v736_v49, %v78_v58  ;;  %v83_v63 = vrot.slane %v736_v49, %v82_v59  ;;  %s351_s18 = scalar_lea.vmem %s843_s3, %s376_s15  ;;  %p66_p0 = scmp.ge.s32.totalorder %s69_s29, 8  }
  0x1a   : > { %94 = vmatpush1.msra.mxu0 %v676_v37  ;;  %401 = vmatpush3.msra.mxu1 %v701_v42 }
  0x1b   : > { %95 = vmatprep.subr.mxu0 %v666_v35  ;;  %402 = vmatprep.subr.mxu1 %v469_v50 }
  0x1c   : > { %96 = vmatpush1.msra.mxu0 %v661_v34  ;;  %403 = vmatpush3.msra.mxu1 %v686_v39 }
  0x1d   : > { %97 = vmatprep.subr.mxu0 %v651_v32  ;;  %404 = vmatprep.subr.mxu1 %v469_v50 }
  0x1e   : > { %98 = vmatpush1.msra.mxu0 %v646_v31  ;;  %405 = vmatpush3.msra.mxu1 %v671_v36 }
  0x1f   : > { %99 = vmatprep.subr.mxu0 %v636_v29  ;;  %406 = vmatprep.subr.mxu1 %v469_v50 }
  0x20   : > { %100 = vmatpush1.msra.mxu0 %v631_v28  ;;  %407 = vmatpush3.msra.mxu1 %v656_v33 }
  0x21   : > { %101 = vmatprep.subr.mxu0 %v621_v26  ;;  %408 = vmatprep.subr.mxu1 %v469_v50 }
  0x22   : > { %102 = vmatpush1.msra.mxu0 %v616_v25  ;;  %409 = vmatpush3.msra.mxu1 %v641_v30 }
  0x23   : > { %103 = vmatprep.subr.mxu0 %v606_v23  ;;  %410 = vmatprep.subr.mxu1 %v469_v50 }
  0x24   : > { %104 = vmatpush1.msra.mxu0 %v601_v22  ;;  %411 = vmatpush3.msra.mxu1 %v626_v27 }
  0x25   : > { %105 = vmatprep.subr.mxu0 %v591_v20  ;;  %412 = vmatprep.subr.mxu1 %v469_v50 }
  0x26   : > { %106 = vmatpush1.msra.mxu0 %v586_v19  ;;  %413 = vmatpush3.msra.mxu1 %v611_v24 }
  0x27   : > { %107 = vmatprep.subr.mxu0 %v576_v17  ;;  %414 = vmatprep.subr.mxu1 %v469_v50 }
  0x28   : > { %108 = vmatpush1.msra.mxu0 %v571_v16  ;;  %415 = vmatpush3.msra.mxu1 %v596_v21 }
  0x29   : > { %109 = vmatprep.subr.mxu0 %v561_v14  ;;  %416 = vmatprep.subr.mxu1 %v469_v50 }
  0x2a   : > { %110 = vmatpush1.msra.mxu0 %v556_v13  ;;  %417 = vmatpush3.msra.mxu1 %v581_v18 }
  0x2b   : > { %111 = vmatprep.subr.mxu0 %v546_v11  ;;  %418 = vmatprep.subr.mxu1 %v469_v50 }
  0x2c   : > { %112 = vmatpush1.msra.mxu0 %v855_v10  ;;  %419 = vmatpush3.msra.mxu1 %v566_v15 }
  0x2d   : > { %113 = vmatprep.subr.mxu0 %v856_v8  ;;  %420 = vmatprep.subr.mxu1 %v469_v50 }
  0x2e   : > { %114 = vmatpush1.msra.mxu0 %v857_v7  ;;  %421 = vmatpush3.msra.mxu1 %v551_v12 }
  0x2f   : > { %115 = vmatprep.subr.mxu0 %v858_v5  ;;  %422 = vmatprep.subr.mxu1 %v469_v50 }
  0x30   : > { %116 = vmatpush1.msra.mxu0 %v859_v4  ;;  %423 = vmatpush3.msra.mxu1 %v860_v9 }
  0x31   : > { %117 = vmatprep.subr.mxu0 %v861_v2  ;;  %424 = vmatprep.subr.mxu1 %v469_v50  ;;  %v292_v2 = vrot.slane %v236_v52, 4 }
  0x32   : > { %118 = vmatpush1.msra.mxu0 %v862_v1  ;;  %425 = vmatpush3.msra.mxu1 %v863_v6  ;;  %v262_v1 = vsub.s32 %v259_v61, %v73_v54 }
  0x33   : > { %152 = vmatmul.mubr.f32.vlgmr.msra.gmra.mxu0 %v70_v51  ;;  %426 = vmatprep.subr.mxu1 %v469_v50 }
  0x34   : > { %427 = vmatpush3.msra.mxu1 %v864_v3  ;;  %428 = vmatprep.mubr.msk.f32.mxu1 %vm470_vm0, %v469_v50  ;;  %v231_v50 = vld [vmem:[%s230_s10] sm:$0x3f]  ;;  %v263_v57 = vrot.slane %v70_v51, %v262_v1 }
  0x35   : > { %429 = vmatmul.mubr.f32.vlgmr.msra.gmra.mxu1 %v70_v51  ;;  %270 = vrot.lane.b32.xlu0 %v236_v52, %s471_s6  ;;  %v246_v58 = vrot.slane %v231_v50, 2 }
  0xf3   : > { %v153_v0 = vpop.f32.mrf.mxu0 }
  0xf4   : > { %v154_v53 = vadd.f32 %v153_v0, %v75_v60 }
  0xf5   : > { %v155_v3 = vpop.f32.mrf.mxu0  ;;  %v224_v56 = vpop.f32.mrf.mxu1 }
  0xf6   : > { %v237_v4 = vadd.f32 %v231_v50, %v154_v53  ;;  %v156_v5 = vadd.f32 %v155_v3, %v79_v62  ;;  %v225_v6 = vadd.f32 %v224_v56, %v83_v63 }
  0xf7   : > { %v430_v55 = vpop.f32.mrf.mxu1 }
  0xf8   : > { %v372_v7 = vmul.f32 -1.442695, %v237_v4  ;;  %v281_v8 = vrot.slane %v156_v5, %v262_v1  ;;  %v294_v9 = vadd.f32 %v292_v2, %v225_v6  ;;  %v308_v10 = vrot.slane %v225_v6, %v262_v1  ;;  %v271_v2 = vpop.permute.xlu0 %270 }
  0xf9   : > { %v272_v6 = vrot.slane %v271_v2, 2  ;;  %v313_v53 = vrot.slane %v271_v2, 4 }
  0xfa   : > { %444 = vpow2.f32 %v372_v7  ;;  %282 = vrot.lane.b32.xlu0 %v281_v8, %s471_s6  ;;  %309 = vrot.lane.b32.xlu1 %v308_v10, %s471_s6  ;;  %v374_v10 = vmul.f32 -1.442695, %v294_v9 }
  0xfe   : > { %264 = vrot.lane.b32.xlu0 %v263_v57, %s471_s6 }
 0x107   : > { %v445_v54 = vpop.eup %444 }
 0x108   : > { %v241_v52 = vadd.f32 1.0, %v445_v54 }
 0x10a   : > { %446 = vrcp.f32 %v241_v52 }
 0x117   : > { %v447_v59 = vpop.eup %446 }
 0x118   : > { %v244_v3 = vmul.f32 %v447_v59, %v156_v5  ;;  %v250_v54 = vsub.f32 1.0, %v447_v59 }
 0x11a   : > { %v248_v60 = vadd.f32 %v246_v58, %v244_v3 }
 0x11c   : > { %448 = vtanh.f32 %v248_v60 }
 0x129   : > { %v449_v4 = vpop.eup %448 }
 0x12a   : > { %252 = vrot.lane.b32.xlu1 %v449_v4, %s471_s6 }
 0x16c   : > { %v283_v7 = vpop.permute.xlu0 %282  ;;  %v310_v50 = vpop.permute.xlu1 %309 }
 0x16d   : > { %v285_v8 = vadd.f32 %v283_v7, %v272_v6 }
 0x16f   : > { %v373_v51 = vmul.f32 -1.442695, %v285_v8 }
 0x170   : > { %v265_v57 = vpop.permute.xlu0 %264 }
 0x171   : > { %450 = vpow2.f32 %v373_v51  ;;  %v267_v9 = vmul.f32 %v447_v59, %v265_v57 }
 0x172   : > { %452 = vpow2.f32 %v374_v10 }
 0x17e   : > { %v451_v61 = vpop.eup %450 }
 0x17f   : > { %v289_v62 = vadd.f32 1.0, %v451_v61  ;;  %v453_v63 = vpop.eup %452 }
 0x180   : > { %v298_v0 = vadd.f32 1.0, %v453_v63 }
 0x181   : > { %454 = vrcp.f32 %v289_v62 }
 0x182   : > { %456 = vrcp.f32 %v298_v0 }
 0x18e   : > { %v455_v5 = vpop.eup %454 }
 0x18f   : > { %v312_v56 = vmul.f32 %v455_v5, %v310_v50  ;;  %v457_v52 = vpop.eup %456 }
 0x190   : > { %v317_v4 = vsub.f32 1.0, %v457_v52  ;;  %v319_v7 = vmul.f32 %v457_v52, %v265_v57 }
 0x191   : > { %v315_v55 = vadd.f32 %v313_v53, %v312_v56 }
 0x193   : > { %458 = vtanh.f32 %v315_v55 }
 0x19c   : > { %v253_v58 = vpop.permute.xlu1 %252 }
 0x19d   : > { %v255_v3 = vmul.f32 %v253_v58, %v250_v54 }
 0x19f   : > { %v268_v60 = vadd.f32 %v267_v9, %v255_v3 }
 0x1a0   : > { %v459_v6 = vpop.eup %458 }
 0x1a1   : > { %v328_v8 = vrot.slane %v268_v60, %v262_v1  ;;  %v318_v51 = vmul.f32 %v459_v6, %v317_v4 }
 0x1a3   : > { %329 = vrot.lane.b32.xlu1 %v328_v8, %s471_s6  ;;  %v320_v2 = vadd.f32 %v319_v7, %v318_v51 }
 0x1a5   : > { %v341_v10 = vrot.slane %v320_v2, %v262_v1 }
 0x1a7   : > { %342 = vrot.lane.b32.xlu0 %v341_v10, %s471_s6 }
 0x215   : > { %v330_v59 = vpop.permute.xlu1 %329 }
 0x216   : > { %333 = vst.msk [vmem:[#allocation2] sm:$0x3] %vm332_vm1, %v330_v59  ;;  %349 = vst.msk [vmem:[%s348_s14] sm:$0x3] %vm332_vm1, %v330_v59 }
 0x219   : > { %v343_v61 = vpop.permute.xlu0 %342  ;;  %68 = sbr.rel (!%p66_p0) target bundleno = 19 (0x13), region = 43 }
 0x21a   : > { %346 = vst.msk [vmem:[#allocation2] sm:$0x3] %vm345_vm2, %v343_v61  ;;  %352 = vst.msk [vmem:[%s351_s18] sm:$0x3] %vm345_vm2, %v343_v61 }

</bundles_post_ra>
